<compile_context>
chip_gen: v7x
topology: tpu7x:2x2x1
jax: 0.10.0
libtpu: 0.0.40
codegen_flags: <defaults>
</compile_context>

<pallas_src>
import functools

import jax
import jax.numpy as jnp
from jax import lax
from jax.experimental import pallas as pl
from jax.experimental.pallas import tpu as pltpu

LN_EPS = 1e-12  # BERT LayerNorm eps


def _round_up(n, m):
    return ((n + m - 1) // m) * m


def _gelu_tanh(x):
    # tanh-approximation GELU (EUP-friendly on TPU), computed in f32
    c = 0.7978845608028654  # sqrt(2/pi)
    return 0.5 * x * (1.0 + jnp.tanh(c * (x + 0.044715 * x * x * x)))


def adapter_bert_output_kernel(
    hs_ref,      # [TM, Dp]  hidden_states tile (bf16, pipelined)
    inp_ref,     # [TM, Hp]  input_tensor tile  (bf16, pipelined)
    wd_ref,      # [Dp, Hp]  base.dense.weight^T          (bf16, resident)
    bd_ref,      # [1,  Hp]  base.dense.bias               (f32,  resident)
    wdn_ref,     # [Hp, Ap]  adapter down-projection W^T   (bf16, resident)
    bdn_ref,     # [1,  Ap]  adapter down-projection bias  (f32,  resident)
    wup_ref,     # [Ap, Hp]  adapter up-projection W^T     (bf16, resident)
    bup_ref,     # [1,  Hp]  adapter up-projection bias    (f32,  resident)
    g_ref,       # [1,  Hp]  LayerNorm gamma               (f32,  resident)
    b_ref,       # [1,  Hp]  LayerNorm beta                (f32,  resident)
    mask_ref,    # [1,  Hp]  1.0 on true-H lanes, 0.0 on padding (f32, resident)
    o_ref,       # [TM, Hp]  output tile (bf16)
    *,
    h_true,      # true hidden size H (LayerNorm reduction length)
    h_padded,    # padded hidden size Hp
):
    # ---- base.dense: bf16 x bf16 -> f32 accumulation on MXU ----
    # TODO(synk): int8 (v5e/v6e) / fp8 (v7x) quantized path for this dominant matmul
    # intentionally not implemented (numerics change).
    h = jnp.dot(hs_ref[...], wd_ref[...],
                preferred_element_type=jnp.float32) + bd_ref[...]

    # ---- base.dropout: eval mode -> identity ----
    # TODO(synk): training-mode dropout (RNG + keep-prob) omitted; eval semantics only.

    # ---- adapter_forward: down-project -> GELU -> up-project -> residual ----
    # NOTE: h is downcast to bf16 for the MXU; with bf16 weights this bounds accuracy
    # to bf16-level (hence the 5e-2 tolerance vs the f32 reference).
    down = jnp.dot(h.astype(wdn_ref.dtype), wdn_ref[...],
                   preferred_element_type=jnp.float32) + bdn_ref[...]
    act = _gelu_tanh(down)                                    # f32 on VPU/EUP
    up = jnp.dot(act.astype(wup_ref.dtype), wup_ref[...],
                 preferred_element_type=jnp.float32) + bup_ref[...]
    adapted = up + h

    # ---- LayerNorm(adapted + input_tensor), stats over true H features only ----
    x = adapted + inp_ref[...].astype(jnp.float32)
    inv_h = 1.0 / float(h_true)
    # Padded lanes of x are exactly 0 (weights/biases/inputs zero-padded), so the sum
    # over Hp equals the sum over H.
    mean = jnp.sum(x, axis=-1, keepdims=True) * inv_h
    cent = x - mean
    if h_padded != h_true:
        cent = cent * mask_ref[...]       # one VPU pass; branch dead when H % 128 == 0
    var = jnp.sum(cent * cent, axis=-1, keepdims=True) * inv_h
    inv = lax.rsqrt(var + LN_EPS)
    o_ref[...] = (g_ref[...] * cent * inv + b_ref[...]).astype(o_ref.dtype)


def _prep2d(x, rows, cols, dtype):
    """Pad/cast a 2-D array only if needed (no-op XLA-wise when already aligned)."""
    r, c = x.shape
    if (r, c) == (rows, cols):
        return x if x.dtype == dtype else x.astype(dtype)
    out = jnp.zeros((rows, cols), dtype)
    return out.at[:r, :c].set(x.astype(dtype))


def _vmem_limit_bytes(tm, d_pad, h_pad, a_pad, weight_buffers):
    """Derive a right-sized scoped-VMEM limit instead of a flat 48 MiB."""
    bf16, f32 = 2, 4
    weights = (d_pad * h_pad + 2 * h_pad * a_pad) * bf16 * weight_buffers
    vectors = (5 * h_pad + a_pad) * f32 * weight_buffers
    streams = 2 * tm * (d_pad + h_pad) * bf16     # hs + inp, double-buffered
    outputs = 2 * tm * h_pad * bf16               # bf16 output, double-buffered
    scratch = tm * (4 * h_pad + a_pad) * f32      # f32 intermediates headroom
    limit = int((weights + vectors + streams + outputs + scratch) * 1.5) + (4 << 20)
    return max(16 << 20, min(limit, 64 << 20))


def adapter_bert_output(hidden_states, input_tensor, params, *, block_m=512,
                        out_dtype=jnp.bfloat16):
    """hidden_states: [B, S, D_in]; input_tensor: [B, S, H] -> [B, S, H] (out_dtype)."""
    B, S, D_in = hidden_states.shape
    H = input_tensor.shape[-1]
    A = params["w_down"].shape[-1]
    M = B * S

    # Lane-dense padding of feature dims to multiples of 128; token tile multiple of 16
    # (bf16 sublane packing).
    d_pad = _round_up(D_in, 128)
    h_pad = _round_up(H, 128)
    a_pad = _round_up(A, 128)

    m16 = _round_up(M, 16)
    tm = max(16, min(_round_up(block_m, 16), m16))
    # Keep >= 2 grid steps (pipelining + v7x megacore) whenever enough tokens exist:
    # shrink TM for small B*S rather than collapsing the grid.
    if pl.cdiv(m16, tm) < 2 and m16 >= 32:
        tm = _round_up(pl.cdiv(m16, 2), 16)
    m_pad = _round_up(M, tm)

    act_dt = jnp.bfloat16

    # All pads/casts below are no-ops when shapes are already aligned and dtypes already
    # bf16/f32 (e.g. BERT with D_in=3072, H=768 and a bf16 producer).
    hs2 = _prep2d(hidden_states.reshape(M, D_in), m_pad, d_pad, act_dt)
    in2 = _prep2d(input_tensor.reshape(M, H), m_pad, h_pad, act_dt)
    wd = _prep2d(params["w_dense"], d_pad, h_pad, act_dt)
    bd = _prep2d(params["b_dense"].reshape(1, H), 1, h_pad, jnp.float32)
    wdn = _prep2d(params["w_down"], h_pad, a_pad, act_dt)
    bdn = _prep2d(params["b_down"].reshape(1, A), 1, a_pad, jnp.float32)
    wup = _prep2d(params["w_up"], a_pad, h_pad, act_dt)
    bup = _prep2d(params["b_up"].reshape(1, H), 1, h_pad, jnp.float32)
    g = _prep2d(params["ln_gamma"].reshape(1, H), 1, h_pad, jnp.float32)
    bb = _prep2d(params["ln_beta"].reshape(1, H), 1, h_pad, jnp.float32)
    mask = (jnp.arange(h_pad) < H).astype(jnp.float32).reshape(1, h_pad)

    args = (hs2, in2, wd, bd, wdn, bdn, wup, bup, g, bb, mask)

    kernel = functools.partial(adapter_bert_output_kernel, h_true=H, h_padded=h_pad)
    grid = (m_pad // tm,)
    row_map = lambda i: (i, 0)
    const_map = lambda i: (0, 0)   # weights/biases resident across all grid steps

    flops = 2 * m_pad * (d_pad * h_pad + 2 * h_pad * a_pad)
    transcendentals = m_pad * a_pad
    bytes_accessed = (
        2 * (hs2.size + in2.size + wd.size + wdn.size + wup.size)     # bf16 streams/weights
        + 4 * (bd.size + bdn.size + bup.size + g.size + bb.size + mask.size)
        + 2 * m_pad * h_pad                                           # bf16 output
    )

    def run(single_buffer_weights):
        res_kwargs = ({"pipeline_mode": pl.Buffered(1)}
                      if single_buffer_weights else {})
        in_specs = [
            pl.BlockSpec((tm, d_pad), row_map),                       # hs tile (pipelined)
            pl.BlockSpec((tm, h_pad), row_map),                       # inp tile (pipelined)
            pl.BlockSpec((d_pad, h_pad), const_map, **res_kwargs),    # w_dense
            pl.BlockSpec((1, h_pad), const_map, **res_kwargs),        # b_dense
            pl.BlockSpec((h_pad, a_pad), const_map, **res_kwargs),    # w_down
            pl.BlockSpec((1, a_pad), const_map, **res_kwargs),        # b_down
            pl.BlockSpec((a_pad, h_pad), const_map, **res_kwargs),    # w_up
            pl.BlockSpec((1, h_pad), const_map, **res_kwargs),        # b_up
            pl.BlockSpec((1, h_pad), const_map, **res_kwargs),        # gamma
            pl.BlockSpec((1, h_pad), const_map, **res_kwargs),        # beta
            pl.BlockSpec((1, h_pad), const_map, **res_kwargs),        # LN lane mask
        ]
        out_specs = pl.BlockSpec((tm, h_pad), row_map)
        return pl.pallas_call(
            kernel,
            out_shape=jax.ShapeDtypeStruct((m_pad, h_pad), out_dtype),
            grid=grid,
            in_specs=in_specs,
            out_specs=out_specs,
            compiler_params=pltpu.CompilerParams(
                dimension_semantics=("parallel",),
                vmem_limit_bytes=_vmem_limit_bytes(
                    tm, d_pad, h_pad, a_pad,
                    weight_buffers=1 if single_buffer_weights else 2),
            ),
            cost_estimate=pl.CostEstimate(
                flops=flops,
                transcendentals=transcendentals,
                bytes_accessed=bytes_accessed,
            ),
        )(*args)

    try:
        out = run(single_buffer_weights=True)
    except Exception:
        # Fallback for jax builds where pipeline_mode=pl.Buffered(1) is not supported on
        # the top-level pallas_call: accept default double-buffering of resident weights.
        out = run(single_buffer_weights=False)

    if m_pad != M or h_pad != H:
        out = out[:M, :H]
    return out.reshape(B, S, H)


def _reference(hidden_states, input_tensor, params):
    h = hidden_states.astype(jnp.float32) @ params["w_dense"] + params["b_dense"]
    down = h @ params["w_down"] + params["b_down"]
    act = _gelu_tanh(down)
    up = act @ params["w_up"] + params["b_up"]
    x = up + h + input_tensor.astype(jnp.float32)
    mean = jnp.mean(x, axis=-1, keepdims=True)
    var = jnp.mean((x - mean) ** 2, axis=-1, keepdims=True)
    return params["ln_gamma"] * (x - mean) * lax.rsqrt(var + LN_EPS) + params["ln_beta"]


if __name__ == "__main__":
    # Small, BERT-output-like shapes: dense maps intermediate(D_in) -> hidden(H),
    # the adapter bottlenecks hidden -> A -> hidden. The TM heuristic splits the 32
    # tokens into a 2-step grid, so the tiled/pipelined path is exercised at toy sizes.
    B, S, D_IN, H, A = 2, 16, 64, 32, 16

    key = jax.random.PRNGKey(0)
    ks = jax.random.split(key, 8)

    hidden_states = jax.random.normal(ks[0], (B, S, D_IN), dtype=jnp.float32)
    input_tensor = jax.random.normal(ks[1], (B, S, H), dtype=jnp.float32)

    params = {
        "w_dense": 0.05 * jax.random.normal(ks[2], (D_IN, H), dtype=jnp.float32),
        "b_dense": 0.01 * jax.random.normal(ks[3], (H,), dtype=jnp.float32),
        "w_down": 0.05 * jax.random.normal(ks[4], (H, A), dtype=jnp.float32),
        "b_down": jnp.zeros((A,), dtype=jnp.float32),
        "w_up": 0.05 * jax.random.normal(ks[5], (A, H), dtype=jnp.float32),
        "b_up": jnp.zeros((H,), dtype=jnp.float32),
        "ln_gamma": jnp.ones((H,), dtype=jnp.float32)
        + 0.01 * jax.random.normal(ks[6], (H,), dtype=jnp.float32),
        "ln_beta": 0.01 * jax.random.normal(ks[7], (H,), dtype=jnp.float32),
    }

    out = adapter_bert_output(hidden_states, input_tensor, params)
    out = jax.block_until_ready(out)

    ref = _reference(hidden_states, input_tensor, params)
    assert out.shape == (B, S, H)
    # bf16 activations/weights/output (f32 MXU accumulation + f32 LN math) -> looser
    # tolerance vs the f32 reference.
    assert jnp.allclose(out.astype(jnp.float32), ref, atol=5e-2, rtol=5e-2), \
        "mismatch vs pure-JAX reference"

    print("KERNEL_OK")
</pallas_src>

<mosaic_0001>
module attributes {stable_mosaic.version = 11 : i64} {
  func.func @adapter_bert_output_kernel(%arg0: i32, %arg1: memref<16x128xbf16, #tpu.memory_space<vmem>>, %arg2: memref<16x128xbf16, #tpu.memory_space<vmem>>, %arg3: memref<128x128xbf16, #tpu.memory_space<vmem>>, %arg4: memref<1x128xf32, #tpu.memory_space<vmem>>, %arg5: memref<128x128xbf16, #tpu.memory_space<vmem>>, %arg6: memref<1x128xf32, #tpu.memory_space<vmem>>, %arg7: memref<128x128xbf16, #tpu.memory_space<vmem>>, %arg8: memref<1x128xf32, #tpu.memory_space<vmem>>, %arg9: memref<1x128xf32, #tpu.memory_space<vmem>>, %arg10: memref<1x128xf32, #tpu.memory_space<vmem>>, %arg11: memref<1x128xf32, #tpu.memory_space<vmem>>, %arg12: memref<16x128xbf16, #tpu.memory_space<vmem>>) attributes {dimension_semantics = [#tpu.dimension_semantics<parallel>], iteration_bounds = array<i64: 2>, scalar_prefetch = 0 : i64, scratch_operands = 0 : i64, tpu.core_type = #tpu.core_type<tc>, window_params = [{transform_indices = @transform_0, window_bounds = array<i64: 16, 128>}, {transform_indices = @transform_1, window_bounds = array<i64: 16, 128>}, {pipeline_mode = #tpu.pipeline_mode<synchronous>, transform_indices = @transform_2, window_bounds = array<i64: 128, 128>}, {pipeline_mode = #tpu.pipeline_mode<synchronous>, transform_indices = @transform_3, window_bounds = array<i64: 1, 128>}, {pipeline_mode = #tpu.pipeline_mode<synchronous>, transform_indices = @transform_4, window_bounds = array<i64: 128, 128>}, {pipeline_mode = #tpu.pipeline_mode<synchronous>, transform_indices = @transform_5, window_bounds = array<i64: 1, 128>}, {pipeline_mode = #tpu.pipeline_mode<synchronous>, transform_indices = @transform_6, window_bounds = array<i64: 128, 128>}, {pipeline_mode = #tpu.pipeline_mode<synchronous>, transform_indices = @transform_7, window_bounds = array<i64: 1, 128>}, {pipeline_mode = #tpu.pipeline_mode<synchronous>, transform_indices = @transform_8, window_bounds = array<i64: 1, 128>}, {pipeline_mode = #tpu.pipeline_mode<synchronous>, transform_indices = @transform_9, window_bounds = array<i64: 1, 128>}, {pipeline_mode = #tpu.pipeline_mode<synchronous>, transform_indices = @transform_10, window_bounds = array<i64: 1, 128>}, {transform_indices = @transform_11, window_bounds = array<i64: 16, 128>}]} {
    %c0 = arith.constant 0 : index
    %c0_0 = arith.constant 0 : index
    %0 = vector.load %arg1[%c0, %c0_0] : memref<16x128xbf16, #tpu.memory_space<vmem>>, vector<16x128xbf16>
    %c0_1 = arith.constant 0 : index
    %c0_2 = arith.constant 0 : index
    %1 = vector.load %arg3[%c0_1, %c0_2] : memref<128x128xbf16, #tpu.memory_space<vmem>>, vector<128x128xbf16>
    %cst = arith.constant dense<0.000000e+00> : vector<16x128xf32>
    %2 = tpu.matmul %0, %1, %cst {dimension_numbers = #tpu.dot_dimension_numbers<[1], [0], [0], [1], [0, 0, 1, 1], [], []>} : vector<16x128xbf16>, vector<128x128xbf16>, vector<16x128xf32> -> vector<16x128xf32>
    %c0_3 = arith.constant 0 : index
    %c0_4 = arith.constant 0 : index
    %3 = vector.load %arg4[%c0_3, %c0_4] : memref<1x128xf32, #tpu.memory_space<vmem>>, vector<1x128xf32>
    %4 = vector.broadcast %3 : vector<1x128xf32> to vector<16x128xf32>
    %5 = arith.addf %2, %4 : vector<16x128xf32>
    %6 = arith.truncf %5 : vector<16x128xf32> to vector<16x128xbf16>
    %c0_5 = arith.constant 0 : index
    %c0_6 = arith.constant 0 : index
    %7 = vector.load %arg5[%c0_5, %c0_6] : memref<128x128xbf16, #tpu.memory_space<vmem>>, vector<128x128xbf16>
    %cst_7 = arith.constant dense<0.000000e+00> : vector<16x128xf32>
    %8 = tpu.matmul %6, %7, %cst_7 {dimension_numbers = #tpu.dot_dimension_numbers<[1], [0], [0], [1], [0, 0, 1, 1], [], []>} : vector<16x128xbf16>, vector<128x128xbf16>, vector<16x128xf32> -> vector<16x128xf32>
    %c0_8 = arith.constant 0 : index
    %c0_9 = arith.constant 0 : index
    %9 = vector.load %arg6[%c0_8, %c0_9] : memref<1x128xf32, #tpu.memory_space<vmem>>, vector<1x128xf32>
    %10 = vector.broadcast %9 : vector<1x128xf32> to vector<16x128xf32>
    %11 = arith.addf %8, %10 : vector<16x128xf32>
    %cst_10 = arith.constant 5.000000e-01 : f32
    %12 = vector.broadcast %cst_10 : f32 to vector<16x128xf32>
    %13 = arith.mulf %12, %11 : vector<16x128xf32>
    %cst_11 = arith.constant 4.471500e-02 : f32
    %14 = vector.broadcast %cst_11 : f32 to vector<16x128xf32>
    %15 = arith.mulf %14, %11 : vector<16x128xf32>
    %16 = arith.mulf %15, %11 : vector<16x128xf32>
    %17 = arith.mulf %16, %11 : vector<16x128xf32>
    %18 = arith.addf %11, %17 : vector<16x128xf32>
    %cst_12 = arith.constant 0.797884583 : f32
    %19 = vector.broadcast %cst_12 : f32 to vector<16x128xf32>
    %20 = arith.mulf %19, %18 : vector<16x128xf32>
    %21 = math.tanh %20 : vector<16x128xf32>
    %cst_13 = arith.constant 1.000000e+00 : f32
    %22 = vector.broadcast %cst_13 : f32 to vector<16x128xf32>
    %23 = arith.addf %22, %21 : vector<16x128xf32>
    %24 = arith.mulf %13, %23 : vector<16x128xf32>
    %25 = arith.truncf %24 : vector<16x128xf32> to vector<16x128xbf16>
    %c0_14 = arith.constant 0 : index
    %c0_15 = arith.constant 0 : index
    %26 = vector.load %arg7[%c0_14, %c0_15] : memref<128x128xbf16, #tpu.memory_space<vmem>>, vector<128x128xbf16>
    %cst_16 = arith.constant dense<0.000000e+00> : vector<16x128xf32>
    %27 = tpu.matmul %25, %26, %cst_16 {dimension_numbers = #tpu.dot_dimension_numbers<[1], [0], [0], [1], [0, 0, 1, 1], [], []>} : vector<16x128xbf16>, vector<128x128xbf16>, vector<16x128xf32> -> vector<16x128xf32>
    %c0_17 = arith.constant 0 : index
    %c0_18 = arith.constant 0 : index
    %28 = vector.load %arg8[%c0_17, %c0_18] : memref<1x128xf32, #tpu.memory_space<vmem>>, vector<1x128xf32>
    %29 = vector.broadcast %28 : vector<1x128xf32> to vector<16x128xf32>
    %30 = arith.addf %27, %29 : vector<16x128xf32>
    %31 = arith.addf %30, %5 : vector<16x128xf32>
    %c0_19 = arith.constant 0 : index
    %c0_20 = arith.constant 0 : index
    %32 = vector.load %arg2[%c0_19, %c0_20] : memref<16x128xbf16, #tpu.memory_space<vmem>>, vector<16x128xbf16>
    %33 = arith.extf %32 : vector<16x128xbf16> to vector<16x128xf32>
    %34 = arith.addf %31, %33 : vector<16x128xf32>
    %cst_21 = arith.constant dense<0.000000e+00> : vector<16xf32>
    %35 = vector.multi_reduction <add>, %34, %cst_21 [1] : vector<16x128xf32> to vector<16xf32>
    %36 = vector.shape_cast %35 : vector<16xf32> to vector<16x1xf32>
    %cst_22 = arith.constant 3.125000e-02 : f32
    %37 = vector.broadcast %cst_22 : f32 to vector<16x1xf32>
    %38 = arith.mulf %36, %37 : vector<16x1xf32>
    %39 = vector.broadcast %38 : vector<16x1xf32> to vector<16x128xf32>
    %40 = arith.subf %34, %39 : vector<16x128xf32>
    %c0_23 = arith.constant 0 : index
    %c0_24 = arith.constant 0 : index
    %41 = vector.load %arg11[%c0_23, %c0_24] : memref<1x128xf32, #tpu.memory_space<vmem>>, vector<1x128xf32>
    %42 = vector.broadcast %41 : vector<1x128xf32> to vector<16x128xf32>
    %43 = arith.mulf %40, %42 : vector<16x128xf32>
    %44 = arith.mulf %43, %43 : vector<16x128xf32>
    %cst_25 = arith.constant dense<0.000000e+00> : vector<16xf32>
    %45 = vector.multi_reduction <add>, %44, %cst_25 [1] : vector<16x128xf32> to vector<16xf32>
    %46 = vector.shape_cast %45 : vector<16xf32> to vector<16x1xf32>
    %cst_26 = arith.constant 3.125000e-02 : f32
    %47 = vector.broadcast %cst_26 : f32 to vector<16x1xf32>
    %48 = arith.mulf %46, %47 : vector<16x1xf32>
    %cst_27 = arith.constant 9.99999996E-13 : f32
    %49 = vector.broadcast %cst_27 : f32 to vector<16x1xf32>
    %50 = arith.addf %48, %49 : vector<16x1xf32>
    %51 = math.rsqrt %50 : vector<16x1xf32>
    %c0_28 = arith.constant 0 : index
    %c0_29 = arith.constant 0 : index
    %52 = vector.load %arg9[%c0_28, %c0_29] : memref<1x128xf32, #tpu.memory_space<vmem>>, vector<1x128xf32>
    %53 = vector.broadcast %52 : vector<1x128xf32> to vector<16x128xf32>
    %54 = arith.mulf %53, %43 : vector<16x128xf32>
    %55 = vector.broadcast %51 : vector<16x1xf32> to vector<16x128xf32>
    %56 = arith.mulf %54, %55 : vector<16x128xf32>
    %c0_30 = arith.constant 0 : index
    %c0_31 = arith.constant 0 : index
    %57 = vector.load %arg10[%c0_30, %c0_31] : memref<1x128xf32, #tpu.memory_space<vmem>>, vector<1x128xf32>
    %58 = vector.broadcast %57 : vector<1x128xf32> to vector<16x128xf32>
    %59 = arith.addf %56, %58 : vector<16x128xf32>
    %60 = arith.truncf %59 : vector<16x128xf32> to vector<16x128xbf16>
    %c0_32 = arith.constant 0 : index
    %c0_33 = arith.constant 0 : index
    %61 = vector.load %arg12[%c0_32, %c0_33] : memref<16x128xbf16, #tpu.memory_space<vmem>>, vector<16x128xbf16>
    tpu.vector_store %arg12[%c0_32, %c0_33], %60 {strides = array<i32>} : memref<16x128xbf16, #tpu.memory_space<vmem>>, vector<16x128xbf16>,
    return
  }
  func.func @transform_0(%arg0: i32) -> (i32, i32) {
    %c0_i32 = arith.constant 0 : i32
    %c0_i32_0 = arith.constant 0 : i32
    return %arg0, %c0_i32 : i32, i32
  }
  func.func @transform_1(%arg0: i32) -> (i32, i32) {
    %c0_i32 = arith.constant 0 : i32
    %c0_i32_0 = arith.constant 0 : i32
    return %arg0, %c0_i32 : i32, i32
  }
  func.func @transform_2(%arg0: i32) -> (i32, i32) {
    %c0_i32 = arith.constant 0 : i32
    %c0_i32_0 = arith.constant 0 : i32
    %c0_i32_1 = arith.constant 0 : i32
    return %c0_i32, %c0_i32_0 : i32, i32
  }
  func.func @transform_3(%arg0: i32) -> (i32, i32) {
    %c0_i32 = arith.constant 0 : i32
    %c0_i32_0 = arith.constant 0 : i32
    %c0_i32_1 = arith.constant 0 : i32
    return %c0_i32, %c0_i32_0 : i32, i32
  }
  func.func @transform_4(%arg0: i32) -> (i32, i32) {
    %c0_i32 = arith.constant 0 : i32
    %c0_i32_0 = arith.constant 0 : i32
    %c0_i32_1 = arith.constant 0 : i32
    return %c0_i32, %c0_i32_0 : i32, i32
  }
  func.func @transform_5(%arg0: i32) -> (i32, i32) {
    %c0_i32 = arith.constant 0 : i32
    %c0_i32_0 = arith.constant 0 : i32
    %c0_i32_1 = arith.constant 0 : i32
    return %c0_i32, %c0_i32_0 : i32, i32
  }
  func.func @transform_6(%arg0: i32) -> (i32, i32) {
    %c0_i32 = arith.constant 0 : i32
    %c0_i32_0 = arith.constant 0 : i32
    %c0_i32_1 = arith.constant 0 : i32
    return %c0_i32, %c0_i32_0 : i32, i32
  }
  func.func @transform_7(%arg0: i32) -> (i32, i32) {
    %c0_i32 = arith.constant 0 : i32
    %c0_i32_0 = arith.constant 0 : i32
    %c0_i32_1 = arith.constant 0 : i32
    return %c0_i32, %c0_i32_0 : i32, i32
  }
  func.func @transform_8(%arg0: i32) -> (i32, i32) {
    %c0_i32 = arith.constant 0 : i32
    %c0_i32_0 = arith.constant 0 : i32
    %c0_i32_1 = arith.constant 0 : i32
    return %c0_i32, %c0_i32_0 : i32, i32
  }
  func.func @transform_9(%arg0: i32) -> (i32, i32) {
    %c0_i32 = arith.constant 0 : i32
    %c0_i32_0 = arith.constant 0 : i32
    %c0_i32_1 = arith.constant 0 : i32
    return %c0_i32, %c0_i32_0 : i32, i32
  }
  func.func @transform_10(%arg0: i32) -> (i32, i32) {
    %c0_i32 = arith.constant 0 : i32
    %c0_i32_0 = arith.constant 0 : i32
    %c0_i32_1 = arith.constant 0 : i32
    return %c0_i32, %c0_i32_0 : i32, i32
  }
  func.func @transform_11(%arg0: i32) -> (i32, i32) {
    %c0_i32 = arith.constant 0 : i32
    %c0_i32_0 = arith.constant 0 : i32
    return %arg0, %c0_i32 : i32, i32
  }
}

module attributes {stable_mosaic.version = 11 : i64} {
  func.func @adapter_bert_output_kernel(%arg0: i32, %arg1: memref<16x128xbf16, #tpu.memory_space<vmem>>, %arg2: memref<16x128xbf16, #tpu.memory_space<vmem>>, %arg3: memref<128x128xbf16, #tpu.memory_space<vmem>>, %arg4: memref<1x128xf32, #tpu.memory_space<vmem>>, %arg5: memref<128x128xbf16, #tpu.memory_space<vmem>>, %arg6: memref<1x128xf32, #tpu.memory_space<vmem>>, %arg7: memref<128x128xbf16, #tpu.memory_space<vmem>>, %arg8: memref<1x128xf32, #tpu.memory_space<vmem>>, %arg9: memref<1x128xf32, #tpu.memory_space<vmem>>, %arg10: memref<1x128xf32, #tpu.memory_space<vmem>>, %arg11: memref<1x128xf32, #tpu.memory_space<vmem>>, %arg12: memref<16x128xbf16, #tpu.memory_space<vmem>>) attributes {dimension_semantics = [#tpu.dimension_semantics<parallel>], iteration_bounds = array<i64: 2>, scalar_prefetch = 0 : i64, scratch_operands = 0 : i64, tpu.core_type = #tpu.core_type<tc>, window_params = [{transform_indices = @transform_0, window_bounds = array<i64: 16, 128>}, {transform_indices = @transform_1, window_bounds = array<i64: 16, 128>}, {pipeline_mode = #tpu.pipeline_mode<synchronous>, transform_indices = @transform_2, window_bounds = array<i64: 128, 128>}, {pipeline_mode = #tpu.pipeline_mode<synchronous>, transform_indices = @transform_3, window_bounds = array<i64: 1, 128>}, {pipeline_mode = #tpu.pipeline_mode<synchronous>, transform_indices = @transform_4, window_bounds = array<i64: 128, 128>}, {pipeline_mode = #tpu.pipeline_mode<synchronous>, transform_indices = @transform_5, window_bounds = array<i64: 1, 128>}, {pipeline_mode = #tpu.pipeline_mode<synchronous>, transform_indices = @transform_6, window_bounds = array<i64: 128, 128>}, {pipeline_mode = #tpu.pipeline_mode<synchronous>, transform_indices = @transform_7, window_bounds = array<i64: 1, 128>}, {pipeline_mode = #tpu.pipeline_mode<synchronous>, transform_indices = @transform_8, window_bounds = array<i64: 1, 128>}, {pipeline_mode = #tpu.pipeline_mode<synchronous>, transform_indices = @transform_9, window_bounds = array<i64: 1, 128>}, {pipeline_mode = #tpu.pipeline_mode<synchronous>, transform_indices = @transform_10, window_bounds = array<i64: 1, 128>}, {transform_indices = @transform_11, window_bounds = array<i64: 16, 128>}]} {
    %c0 = arith.constant 0 : index
    %c0_0 = arith.constant 0 : index
    %0 = vector.load %arg1[%c0, %c0_0] : memref<16x128xbf16, #tpu.memory_space<vmem>>, vector<16x128xbf16>
    %c0_1 = arith.constant 0 : index
    %c0_2 = arith.constant 0 : index
    %1 = vector.load %arg3[%c0_1, %c0_2] : memref<128x128xbf16, #tpu.memory_space<vmem>>, vector<128x128xbf16>
    %cst = arith.constant dense<0.000000e+00> : vector<16x128xf32>
    %2 = tpu.matmul %0, %1, %cst {dimension_numbers = #tpu.dot_dimension_numbers<[1], [0], [0], [1], [0, 0, 1, 1], [], []>} : vector<16x128xbf16>, vector<128x128xbf16>, vector<16x128xf32> -> vector<16x128xf32>
    %c0_3 = arith.constant 0 : index
    %c0_4 = arith.constant 0 : index
    %3 = vector.load %arg4[%c0_3, %c0_4] : memref<1x128xf32, #tpu.memory_space<vmem>>, vector<1x128xf32>
    %4 = vector.broadcast %3 : vector<1x128xf32> to vector<16x128xf32>
    %5 = arith.addf %2, %4 : vector<16x128xf32>
    %6 = arith.truncf %5 : vector<16x128xf32> to vector<16x128xbf16>
    %c0_5 = arith.constant 0 : index
    %c0_6 = arith.constant 0 : index
    %7 = vector.load %arg5[%c0_5, %c0_6] : memref<128x128xbf16, #tpu.memory_space<vmem>>, vector<128x128xbf16>
    %cst_7 = arith.constant dense<0.000000e+00> : vector<16x128xf32>
    %8 = tpu.matmul %6, %7, %cst_7 {dimension_numbers = #tpu.dot_dimension_numbers<[1], [0], [0], [1], [0, 0, 1, 1], [], []>} : vector<16x128xbf16>, vector<128x128xbf16>, vector<16x128xf32> -> vector<16x128xf32>
    %c0_8 = arith.constant 0 : index
    %c0_9 = arith.constant 0 : index
    %9 = vector.load %arg6[%c0_8, %c0_9] : memref<1x128xf32, #tpu.memory_space<vmem>>, vector<1x128xf32>
    %10 = vector.broadcast %9 : vector<1x128xf32> to vector<16x128xf32>
    %11 = arith.addf %8, %10 : vector<16x128xf32>
    %cst_10 = arith.constant 5.000000e-01 : f32
    %12 = vector.broadcast %cst_10 : f32 to vector<16x128xf32>
    %13 = arith.mulf %12, %11 : vector<16x128xf32>
    %cst_11 = arith.constant 4.471500e-02 : f32
    %14 = vector.broadcast %cst_11 : f32 to vector<16x128xf32>
    %15 = arith.mulf %14, %11 : vector<16x128xf32>
    %16 = arith.mulf %15, %11 : vector<16x128xf32>
    %17 = arith.mulf %16, %11 : vector<16x128xf32>
    %18 = arith.addf %11, %17 : vector<16x128xf32>
    %cst_12 = arith.constant 0.797884583 : f32
    %19 = vector.broadcast %cst_12 : f32 to vector<16x128xf32>
    %20 = arith.mulf %19, %18 : vector<16x128xf32>
    %21 = math.tanh %20 : vector<16x128xf32>
    %cst_13 = arith.constant 1.000000e+00 : f32
    %22 = vector.broadcast %cst_13 : f32 to vector<16x128xf32>
    %23 = arith.addf %22, %21 : vector<16x128xf32>
    %24 = arith.mulf %13, %23 : vector<16x128xf32>
    %25 = arith.truncf %24 : vector<16x128xf32> to vector<16x128xbf16>
    %c0_14 = arith.constant 0 : index
    %c0_15 = arith.constant 0 : index
    %26 = vector.load %arg7[%c0_14, %c0_15] : memref<128x128xbf16, #tpu.memory_space<vmem>>, vector<128x128xbf16>
    %cst_16 = arith.constant dense<0.000000e+00> : vector<16x128xf32>
    %27 = tpu.matmul %25, %26, %cst_16 {dimension_numbers = #tpu.dot_dimension_numbers<[1], [0], [0], [1], [0, 0, 1, 1], [], []>} : vector<16x128xbf16>, vector<128x128xbf16>, vector<16x128xf32> -> vector<16x128xf32>
    %c0_17 = arith.constant 0 : index
    %c0_18 = arith.constant 0 : index
    %28 = vector.load %arg8[%c0_17, %c0_18] : memref<1x128xf32, #tpu.memory_space<vmem>>, vector<1x128xf32>
    %29 = vector.broadcast %28 : vector<1x128xf32> to vector<16x128xf32>
    %30 = arith.addf %27, %29 : vector<16x128xf32>
    %31 = arith.addf %30, %5 : vector<16x128xf32>
    %c0_19 = arith.constant 0 : index
    %c0_20 = arith.constant 0 : index
    %32 = vector.load %arg2[%c0_19, %c0_20] : memref<16x128xbf16, #tpu.memory_space<vmem>>, vector<16x128xbf16>
    %33 = arith.extf %32 : vector<16x128xbf16> to vector<16x128xf32>
    %34 = arith.addf %31, %33 : vector<16x128xf32>
    %cst_21 = arith.constant dense<0.000000e+00> : vector<16xf32>
    %35 = vector.multi_reduction <add>, %34, %cst_21 [1] : vector<16x128xf32> to vector<16xf32>
    %36 = vector.shape_cast %35 : vector<16xf32> to vector<16x1xf32>
    %cst_22 = arith.constant 3.125000e-02 : f32
    %37 = vector.broadcast %cst_22 : f32 to vector<16x1xf32>
    %38 = arith.mulf %36, %37 : vector<16x1xf32>
    %39 = vector.broadcast %38 : vector<16x1xf32> to vector<16x128xf32>
    %40 = arith.subf %34, %39 : vector<16x128xf32>
    %c0_23 = arith.constant 0 : index
    %c0_24 = arith.constant 0 : index
    %41 = vector.load %arg11[%c0_23, %c0_24] : memref<1x128xf32, #tpu.memory_space<vmem>>, vector<1x128xf32>
    %42 = vector.broadcast %41 : vector<1x128xf32> to vector<16x128xf32>
    %43 = arith.mulf %40, %42 : vector<16x128xf32>
    %44 = arith.mulf %43, %43 : vector<16x128xf32>
    %cst_25 = arith.constant dense<0.000000e+00> : vector<16xf32>
    %45 = vector.multi_reduction <add>, %44, %cst_25 [1] : vector<16x128xf32> to vector<16xf32>
    %46 = vector.shape_cast %45 : vector<16xf32> to vector<16x1xf32>
    %cst_26 = arith.constant 3.125000e-02 : f32
    %47 = vector.broadcast %cst_26 : f32 to vector<16x1xf32>
    %48 = arith.mulf %46, %47 : vector<16x1xf32>
    %cst_27 = arith.constant 9.99999996E-13 : f32
    %49 = vector.broadcast %cst_27 : f32 to vector<16x1xf32>
    %50 = arith.addf %48, %49 : vector<16x1xf32>
    %51 = math.rsqrt %50 : vector<16x1xf32>
    %c0_28 = arith.constant 0 : index
    %c0_29 = arith.constant 0 : index
    %52 = vector.load %arg9[%c0_28, %c0_29] : memref<1x128xf32, #tpu.memory_space<vmem>>, vector<1x128xf32>
    %53 = vector.broadcast %52 : vector<1x128xf32> to vector<16x128xf32>
    %54 = arith.mulf %53, %43 : vector<16x128xf32>
    %55 = vector.broadcast %51 : vector<16x1xf32> to vector<16x128xf32>
    %56 = arith.mulf %54, %55 : vector<16x128xf32>
    %c0_30 = arith.constant 0 : index
    %c0_31 = arith.constant 0 : index
    %57 = vector.load %arg10[%c0_30, %c0_31] : memref<1x128xf32, #tpu.memory_space<vmem>>, vector<1x128xf32>
    %58 = vector.broadcast %57 : vector<1x128xf32> to vector<16x128xf32>
    %59 = arith.addf %56, %58 : vector<16x128xf32>
    %60 = arith.truncf %59 : vector<16x128xf32> to vector<16x128xbf16>
    %c0_32 = arith.constant 0 : index
    %c0_33 = arith.constant 0 : index
    %61 = vector.load %arg12[%c0_32, %c0_33] : memref<16x128xbf16, #tpu.memory_space<vmem>>, vector<16x128xbf16>
    tpu.vector_store %arg12[%c0_32, %c0_33], %60 {strides = array<i32>} : memref<16x128xbf16, #tpu.memory_space<vmem>>, vector<16x128xbf16>,
    return
  }
  func.func @transform_0(%arg0: i32) -> (i32, i32) {
    %c0_i32 = arith.constant 0 : i32
    %c0_i32_0 = arith.constant 0 : i32
    return %arg0, %c0_i32 : i32, i32
  }
  func.func @transform_1(%arg0: i32) -> (i32, i32) {
    %c0_i32 = arith.constant 0 : i32
    %c0_i32_0 = arith.constant 0 : i32
    return %arg0, %c0_i32 : i32, i32
  }
  func.func @transform_2(%arg0: i32) -> (i32, i32) {
    %c0_i32 = arith.constant 0 : i32
    %c0_i32_0 = arith.constant 0 : i32
    %c0_i32_1 = arith.constant 0 : i32
    return %c0_i32, %c0_i32_0 : i32, i32
  }
  func.func @transform_3(%arg0: i32) -> (i32, i32) {
    %c0_i32 = arith.constant 0 : i32
    %c0_i32_0 = arith.constant 0 : i32
    %c0_i32_1 = arith.constant 0 : i32
    return %c0_i32, %c0_i32_0 : i32, i32
  }
  func.func @transform_4(%arg0: i32) -> (i32, i32) {
    %c0_i32 = arith.constant 0 : i32
    %c0_i32_0 = arith.constant 0 : i32
    %c0_i32_1 = arith.constant 0 : i32
    return %c0_i32, %c0_i32_0 : i32, i32
  }
  func.func @transform_5(%arg0: i32) -> (i32, i32) {
    %c0_i32 = arith.constant 0 : i32
    %c0_i32_0 = arith.constant 0 : i32
    %c0_i32_1 = arith.constant 0 : i32
    return %c0_i32, %c0_i32_0 : i32, i32
  }
  func.func @transform_6(%arg0: i32) -> (i32, i32) {
    %c0_i32 = arith.constant 0 : i32
    %c0_i32_0 = arith.constant 0 : i32
    %c0_i32_1 = arith.constant 0 : i32
    return %c0_i32, %c0_i32_0 : i32, i32
  }
  func.func @transform_7(%arg0: i32) -> (i32, i32) {
    %c0_i32 = arith.constant 0 : i32
    %c0_i32_0 = arith.constant 0 : i32
    %c0_i32_1 = arith.constant 0 : i32
    return %c0_i32, %c0_i32_0 : i32, i32
  }
  func.func @transform_8(%arg0: i32) -> (i32, i32) {
    %c0_i32 = arith.constant 0 : i32
    %c0_i32_0 = arith.constant 0 : i32
    %c0_i32_1 = arith.constant 0 : i32
    return %c0_i32, %c0_i32_0 : i32, i32
  }
  func.func @transform_9(%arg0: i32) -> (i32, i32) {
    %c0_i32 = arith.constant 0 : i32
    %c0_i32_0 = arith.constant 0 : i32
    %c0_i32_1 = arith.constant 0 : i32
    return %c0_i32, %c0_i32_0 : i32, i32
  }
  func.func @transform_10(%arg0: i32) -> (i32, i32) {
    %c0_i32 = arith.constant 0 : i32
    %c0_i32_0 = arith.constant 0 : i32
    %c0_i32_1 = arith.constant 0 : i32
    return %c0_i32, %c0_i32_0 : i32, i32
  }
  func.func @transform_11(%arg0: i32) -> (i32, i32) {
    %c0_i32 = arith.constant 0 : i32
    %c0_i32_0 = arith.constant 0 : i32
    return %arg0, %c0_i32 : i32, i32
  }
}

</mosaic_0001>

<bundles_post_ra>
// kernel: tpu_custom_call.1
= control target key start
LH: loop header
LB: loop body
LE: loop exit
PB: predicated region body
PF: predicated region fallthrough
CT: control target
= control target key end

     0   :  { %s2018_s0 = inlined_call_operand.hbm [shape: bf16[32,128], index: 0, kind: input, shape index: {}]   ;;  %s2019_s1 = inlined_call_operand.hbm [shape: bf16[32,128], index: 1, kind: input, shape index: {}]   ;;  %s2020_s2 = inlined_call_operand.hbm [shape: bf16[128,128], index: 2, kind: input, shape index: {}]   ;;  %s2021_s3 = inlined_call_operand.vmem [shape: f32[1,128], index: 3, kind: input, shape index: {}]   ;;  %s2022_s4 = inlined_call_operand.hbm [shape: bf16[128,128], index: 4, kind: input, shape index: {}]   ;;  %s2023_s5 = inlined_call_operand.vmem [shape: f32[1,128], index: 5, kind: input, shape index: {}]   ;;  %s2024_s6 = inlined_call_operand.hbm [shape: bf16[128,128], index: 6, kind: input, shape index: {}]   ;;  %s2025_s7 = inlined_call_operand.vmem [shape: f32[1,128], index: 7, kind: input, shape index: {}]   ;;  %s2026_s8 = inlined_call_operand.vmem [shape: f32[1,128], index: 8, kind: input, shape index: {}]   ;;  %s2027_s9 = inlined_call_operand.vmem [shape: f32[1,128], index: 9, kind: input, shape index: {}]   ;;  %s2028_s10 = inlined_call_operand.vmem [shape: f32[1,128], index: 10, kind: input, shape index: {}]   ;;  %s2029_s11 = inlined_call_operand.hbm [shape: bf16[32,128], index: 11, kind: output, shape index: {}]  }
   0x1   :  { %2040 = sst [smem:[#allocation20_spill]] %s2018_s0 }
   0x2   :  { %2041 = sst [smem:[#allocation21_spill]] %s2020_s2 }
   0x3   :  { %2042 = sst [smem:[#allocation22_spill]] %s2022_s4 }
   0x4   :  { %2043 = sst [smem:[#allocation23_spill]] %s2024_s6 }
   0x5   :  { %2044 = sst [smem:[#allocation24_spill]] %s2026_s8 }
   0x6   :  { %2045 = sst [smem:[#allocation25_spill]] %s2027_s9 }
   0x7   :  { %2046 = sst [smem:[#allocation26_spill]] %s2029_s11 }
   0x8   :  { %16 = vsyncpa [#allocation3], 0 }
   0x9   :  { %18 = vsyncpa [#allocation3 + $0x1], 0 }
   0xa   :  { %19 = vsyncpa [#allocation6], 0 }
   0xb   :  { %21 = vsyncpa [#allocation6 + $0x1], 0 }
   0xc   :  { %22 = vsyncpa [#allocation9], 0 }
   0xd   :  { %23 = vsyncpa [#allocation4], 0 }
   0xe   :  { %25 = vsyncpa [#allocation4 + $0x1], 0  ;;  %s1636_s17 = smov 0   ;;  %s1638_s18 = smov 0  }
   0xf   :  { %s1640_s19 = smov 0   ;;  %s1642_s20 = smov 0  }
  0x10 LB: > { %2047 = sst [smem:[#allocation17_spill]] %s1550_s17  ;;  %s1657_s21 = sadd.s32 4294967295, %s1562_s20   ;;  %s1562_s20 = sphi %s1642_s20, %s2081_s20   ;;  %s1558_s19 = sphi %s1640_s19, %s2080_s19   ;;  %s1554_s18 = sphi %s1638_s18, %s2079_s18   ;;  %s1550_s17 = sphi %s1636_s17, %s2078_s17  }
  0x11   : > { %s1061_s22 = sadd.s32 4294967294, %s1562_s20   ;;  %p51_p0 = scmp.ne.s32.totalorder %s1554_s18, %s1550_s17 }
  0x12   : > { %p2031_p1 = scmp.eq.s32.totalorder %s1657_s21, 0  ;;  %p296_p3 = scmp.eq.s32.totalorder %s1061_s22, 1 }
  0x13   : > { %p1062_p5 = scmp.ge.s32.totalorder %s1562_s20, 1  ;;  %p303_p7 = scmp.lt.s32.totalorder %s1562_s20, 3 }
  0x14   : > { %p1666_p4 = por %p2031_p1, %p51_p0  ;;  %p1671_p6 = por %p296_p3, %p51_p0 }
  0x15   : > { %p1676_p8 = pnand %p1062_p5, %p303_p7  ;;  %s1564_s26 = smov [#allocation7]  }
  0x16   : > { %s2048_s23 = scalar_select %p1666_p4, 1, 0 }
  0x17   : > { %s2049_s24 = scalar_select %p1671_p6, 1, 0 }
  0x18   : > { %s2051_s25 = scalar_select %p1676_p8, 1, 0 }
  0x19   : > { %2050 = sst [smem:[#allocation18_spill]] %s2049_s24  ;;  %s315_s27 = sshll.u32 %s1564_s26, 4  ;;  %s1680_s27 = int_to_ptr.vmem [resolvable:$true] %s315_s27 }
  0x1a   : > { %p1237_p9 = pneg %p1676_p8  ;;  %s1565_s29 = smov [#allocation8]  }
  0x1b   : > { %s331_s30 = sshll.u32 %s1565_s29, 4  ;;  %s1566_s12 = smov [#allocation10]   ;;  %s1691_s30 = int_to_ptr.vmem [resolvable:$true] %s331_s30 }
  0x1c   : > { %p1687_p11 = pnand %p1237_p9, %p2031_p1  ;;  %s1693_s13 = sshll.u32 %s1566_s12, 4  ;;  %s348_s13 = int_to_ptr.vmem [resolvable:$true] %s1693_s13 }
  0x1d   : > { %s2053_s2 = sld [smem:[#allocation21_spill]] }
  0x1e   : > { %p1703_p13 = pneg %p1687_p11 }
  0x23   : > { %s1340_s16 = scalar_lea.hbm %s2053_s2, 1024 }
  0x24   : > { %p1341_p12 = scmp.ne.s32.totalorder %s2053_s2, %s1340_s16  ;;  %p1347_p5 = scmp.lt.u32.totalorder %s1340_s16, %s2053_s2 }
  0x26   : > { %p1343_p0 = pnand %p1703_p13, %p1341_p12 }
  0x28   : > { %p1344_p3 = pneg %p1343_p0 }
  0x2a   : > { %p1349_p7 = pnand %p1347_p5, %p1344_p3 }
  0x2c   : > { %1352 = shalt.err (!%p1349_p7)
}
  0x2d   : > { %s1353_s14 = scalar_lea.vmem %s1680_s27, 1024  ;;  %p1361_p2 = scmp.lt.s32.totalorder %s1680_s27, %s1680_s27 }
  0x2e   : > { %p1354_p9 = scmp.ne.s32.totalorder %s1680_s27, %s1353_s14  ;;  %p1362_p6 = scmp.lt.s32.totalorder %s1353_s14, %s1353_s14 }
  0x30   : > { %p1356_p10 = pnand %p1354_p9, %p1703_p13  ;;  %p1363_p12 = por %p1362_p6, %p1361_p2 }
  0x32   : > { %p1357_p1 = pneg %p1356_p10 }
  0x34   : > { %p1364_p0 = pnand %p1363_p12, %p1357_p1 }
  0x36   : > { %1367 = shalt.err (!%p1364_p0)
}
  0x37   : > { %s2036_s15 = smov 64   ;;  %s2038_s16 = smov 4  }
  0x38   : > { %1240 = dma.hbm_to_vmem [thread:$0]  (!%p1687_p11), %s2053_s2, 1024, %s1680_s27, [#allocation6], %s2036_s15, %s2036_s15, %s2038_s16  }
  0x39   : > { %s2055_s4 = sld [smem:[#allocation22_spill]] }
  0x3f   : > { %s1368_s14 = scalar_lea.hbm %s2055_s4, 1024 }
  0x40   : > { %p1369_p1 = scmp.ne.s32.totalorder %s2055_s4, %s1368_s14  ;;  %p1375_p10 = scmp.lt.u32.totalorder %s1368_s14, %s2055_s4 }
  0x42   : > { %p1371_p2 = pnand %p1369_p1, %p1703_p13 }
  0x44   : > { %p1372_p6 = pneg %p1371_p2 }
  0x46   : > { %p1377_p3 = pnand %p1375_p10, %p1372_p6 }
  0x48   : > { %1380 = shalt.err (!%p1377_p3)
}
  0x49   : > { %s1381_s27 = scalar_lea.vmem %s1691_s30, 1024  ;;  %p1389_p12 = scmp.lt.s32.totalorder %s1691_s30, %s1691_s30 }
  0x4a   : > { %p1382_p5 = scmp.ne.s32.totalorder %s1691_s30, %s1381_s27  ;;  %p1390_p0 = scmp.lt.s32.totalorder %s1381_s27, %s1381_s27 }
  0x4c   : > { %p1384_p7 = pnand %p1382_p5, %p1703_p13  ;;  %p1391_p1 = por %p1390_p0, %p1389_p12 }
  0x4e   : > { %p1385_p9 = pneg %p1384_p7 }
  0x50   : > { %p1392_p2 = pnand %p1391_p1, %p1385_p9 }
  0x52   : > { %1395 = shalt.err (!%p1392_p2)
}
  0x53   : > { %1243 = dma.hbm_to_vmem [thread:$0]  (!%p1687_p11), %s2055_s4, 1024, %s1691_s30, [#allocation9], %s2036_s15, %s2036_s15, %s2038_s16  }
  0x54   : > { %s2056_s6 = sld [smem:[#allocation23_spill]] }
  0x5a   : > { %s1396_s22 = scalar_lea.hbm %s2056_s6, 1024 }
  0x5b   : > { %p1397_p6 = scmp.ne.s32.totalorder %s2056_s6, %s1396_s22  ;;  %p1403_p5 = scmp.lt.u32.totalorder %s1396_s22, %s2056_s6 }
  0x5d   : > { %p1399_p10 = pnand %p1397_p6, %p1703_p13 }
  0x5f   : > { %p1400_p3 = pneg %p1399_p10 }
  0x61   : > { %p1405_p7 = pnand %p1403_p5, %p1400_p3 }
  0x63   : > { %1408 = shalt.err (!%p1405_p7)
}
  0x64   : > { %s1409_s27 = scalar_lea.vmem %s348_s13, 1024  ;;  %p1417_p1 = scmp.lt.s32.totalorder %s348_s13, %s348_s13 }
  0x65   : > { %p1410_p9 = scmp.ne.s32.totalorder %s348_s13, %s1409_s27  ;;  %p1418_p2 = scmp.lt.s32.totalorder %s1409_s27, %s1409_s27 }
  0x67   : > { %p1412_p12 = pnand %p1410_p9, %p1703_p13  ;;  %p1419_p4 = por %p1418_p2, %p1417_p1 }
  0x69   : > { %p1413_p0 = pneg %p1412_p12 }
  0x6b   : > { %p1420_p8 = pnand %p1419_p4, %p1413_p0 }
  0x6d   : > { %1423 = shalt.err (!%p1420_p8)
}
  0x6e   : > { %1246 = dma.hbm_to_vmem [thread:$0]  (!%p1687_p11), %s2056_s6, 1024, %s348_s13, [#allocation9], %s2036_s15, %s2036_s15, %s2038_s16  }
  0x6f   : > { %s1776_s24 = sadd.s32 1, %s1562_s20   ;;  %s38_s9 = sadd.s32 1, %s1558_s19 }
  0x70   : > { %s35_s28 = ssub.s32 %s1562_s20, %s1776_s24  ;;  %p45_p8 = scmp.ne.s32.totalorder %s1558_s19, %s1554_s18 }
  0x71   : > { %p36_p4 = scmp.eq.s32.totalorder %s35_s28, 0  ;;  %p46_p13 = scmp.eq.s32.totalorder %s1562_s20, 0 }
  0x72   : > { %p1261_p6 = scmp.lt.s32.totalorder %s1562_s20, 2  ;;  %p2058_p3 = scmp.eq.s32.totalorder %s1657_s21, 1 }
  0x73   : > { %s1786_s11 = scalar_select %p36_p4, %s1558_s19, %s38_s9  }
  0x74   : > { %p47_p10 = por %p46_p13, %p45_p8  ;;  %p1790_p5 = por %p2058_p3, %p45_p8 }
  0x75   : > { %2057 = sst [smem:[#allocation19_spill]] %s1786_s11  ;;  %s373_s22 = sand.u32 1, %s1558_s19  }
  0x76   : > { %s1118_s26 = sshll.u32 %s1562_s20, 7  ;;  %s1796_s13 = sshll.u32 %s373_s22, 3 }
  0x77   : > { %s2060_s0 = sld [smem:[#allocation20_spill]]  ;;  %s377_s27 = scalar_lea.vmem [#allocation2], %s1796_s13 }
  0x78   : > { %s384_s30 = sshll.u32 %s377_s27, 4  ;;  %p1804_p11 = pnand %p1261_p6, %p47_p10  ;;  %s1808_s30 = int_to_ptr.vmem [resolvable:$true] %s384_s30 }
  0x79   : > { %s1813_s29 = scalar_lea.hbm %s2019_s1, %s1118_s26  ;;  %s1815_s12 = scalar_lea.sflag [#allocation3], %s373_s22 }
  0x7a   : > { %p1426_p9 = pneg %p1804_p11 }
  0x7d   : > { %s1801_s14 = scalar_lea.hbm %s2060_s0, %s1118_s26  ;;  %s1429_s2 = scalar_lea.hbm %s2060_s0, 256 }
  0x7e   : > { %s1424_s15 = scalar_lea.hbm %s1801_s14, 128  ;;  %p1430_p1 = scmp.lt.u32.totalorder %s1801_s14, %s2060_s0 }
  0x7f   : > { %p1425_p7 = scmp.ne.s32.totalorder %s1801_s14, %s1424_s15  ;;  %p1431_p2 = scmp.lt.u32.totalorder %s1429_s2, %s1424_s15 }
  0x80   : > { %p1433_p8 = scmp.lt.u32.totalorder %s1424_s15, %s1801_s14 }
  0x81   : > { %p1427_p12 = pnand %p1426_p9, %p1425_p7  ;;  %p1432_p4 = por %p1431_p2, %p1430_p1 }
  0x83   : > { %p1428_p0 = pneg %p1427_p12  ;;  %p1434_p13 = por %p1433_p8, %p1432_p4 }
  0x85   : > { %p1435_p6 = pnand %p1434_p13, %p1428_p0 }
  0x87   : > { %1438 = shalt.err (!%p1435_p6)
}
  0x88   : > { %s1439_s22 = scalar_lea.vmem %s1808_s30, 128  ;;  %s1569_s16 = smov [#allocation2]  }
  0x89   : > { %p1440_p10 = scmp.ne.s32.totalorder %s1808_s30, %s1439_s22  ;;  %s1444_s26 = sshll.u32 %s1569_s16, 4  ;;  %s1445_s26 = int_to_ptr.vmem [resolvable:$false] %s1444_s26 }
  0x8a   : > { %s1446_s4 = scalar_lea.vmem %s1445_s26, 256  ;;  %p1447_p12 = scmp.lt.s32.totalorder %s1808_s30, %s1445_s26 }
  0x8b   : > { %p1442_p3 = pnand %p1440_p10, %p1426_p9  ;;  %p1448_p1 = scmp.lt.s32.totalorder %s1446_s4, %s1439_s22 }
  0x8d   : > { %p1443_p7 = pneg %p1442_p3  ;;  %p1449_p2 = por %p1448_p1, %p1447_p12 }
  0x8f   : > { %p1450_p4 = pnand %p1449_p2, %p1443_p7 }
  0x91   : > { %1453 = shalt.err (!%p1450_p4)
}
  0x92   : > { %s2062_s2 = smov 4   ;;  %s2063_s6 = smov 64  }
  0x93   : > { %1250 = dma.hbm_to_vmem [thread:$0]  (!%p1804_p11), %s1801_s14, 128, %s1808_s30, %s1815_s12, %s2063_s6, %s2063_s6, %s2062_s2  }
  0x94   : > { %s398_s15 = scalar_lea.vmem [#allocation5], %s1796_s13  ;;  %s394_s9 = sand.u32 1, %s1562_s20  }
  0x95   : > { %s405_s28 = sshll.u32 %s398_s15, 4  ;;  %s1850_s27 = scalar_lea.sflag [#allocation6], %s394_s9  ;;  %s1848_s28 = int_to_ptr.vmem [resolvable:$true] %s405_s28 }
  0x96   : > { %s1454_s22 = scalar_lea.hbm %s1813_s29, 128  ;;  %s1459_s4 = scalar_lea.hbm %s2019_s1, 256 }
  0x97   : > { %p1455_p0 = scmp.ne.s32.totalorder %s1813_s29, %s1454_s22  ;;  %p1460_p6 = scmp.lt.u32.totalorder %s1813_s29, %s2019_s1 }
  0x98   : > { %p1461_p10 = scmp.lt.u32.totalorder %s1459_s4, %s1454_s22  ;;  %p1463_p7 = scmp.lt.u32.totalorder %s1454_s22, %s1813_s29 }
  0x99   : > { %p1457_p8 = pnand %p1455_p0, %p1426_p9 }
  0x9a   : > { %p1462_p3 = por %p1461_p10, %p1460_p6 }
  0x9b   : > { %p1458_p13 = pneg %p1457_p8 }
  0x9c   : > { %p1464_p12 = por %p1463_p7, %p1462_p3 }
  0x9e   : > { %p1465_p1 = pnand %p1464_p12, %p1458_p13 }
  0xa0   : > { %1468 = shalt.err (!%p1465_p1)
}
  0xa1   : > { %s1469_s13 = scalar_lea.vmem %s1848_s28, 128  ;;  %s1570_s14 = smov [#allocation5]  }
  0xa2   : > { %p1470_p2 = scmp.ne.s32.totalorder %s1848_s28, %s1469_s13  ;;  %s1474_s30 = sshll.u32 %s1570_s14, 4  ;;  %s1475_s30 = int_to_ptr.vmem [resolvable:$false] %s1474_s30 }
  0xa3   : > { %s1476_s0 = scalar_lea.vmem %s1475_s30, 256  ;;  %p1477_p8 = scmp.lt.s32.totalorder %s1848_s28, %s1475_s30 }
  0xa4   : > { %p1472_p4 = pnand %p1470_p2, %p1426_p9  ;;  %p1478_p6 = scmp.lt.s32.totalorder %s1476_s0, %s1469_s13 }
  0xa6   : > { %p1473_p0 = pneg %p1472_p4  ;;  %p1479_p10 = por %p1478_p6, %p1477_p8 }
  0xa8   : > { %p1480_p3 = pnand %p1479_p10, %p1473_p0 }
  0xaa   : > { %1483 = shalt.err (!%p1480_p3)
}
  0xab   : > { %1253 = dma.hbm_to_vmem [thread:$0]  (!%p1804_p11), %s1813_s29, 128, %s1848_s28, %s1850_s27, %s2063_s6, %s2063_s6, %s2062_s2  }
  0xac   : > { %p2064_p9 = scmp.ne.s32.totalorder %s2051_s25, 0 }
  0xad   : > { %s1882_s11 = sand.u32 (!%p2064_p9), 1, %s1554_s18   ;;  %p2065_p13 = scmp.ne.s32.totalorder (!%p2064_p9), %s2048_s23, 0 }
  0xae   : > { %417 = sbr.rel (%p2064_p9) target bundleno = 1237 (0x4d5), region = 64  ;;  %s1885_s12 = sshll.u32 (!%p2064_p9), %s1882_s11, 3 }
  0xaf   : > { %s420_s8 = scalar_lea.sflag (!%p2064_p9), [#allocation3], %s1882_s11  ;;  %s423_s15 = scalar_lea.vmem (!%p2064_p9), [#allocation2], %s1885_s12 }
  0xb5   : > { %1529 = dma.done.wait (%p2065_p13), %s420_s8, 128  }
  0xb6   : > { %1531 = vsyncadd (%p2065_p13), %s420_s8, 4294967168  ;;  %s428_s25 = sand.u32 1, %s1657_s21   ;;  %s432_s2 = scalar_lea.vmem [#allocation5], %s1885_s12 }
  0xb7   : > { %s429_s29 = scalar_lea.sflag [#allocation6], %s428_s25 }
  0xb8   : > { %1533 = dma.done.wait (%p2065_p13), %s429_s29, 128  }
  0xb9   : > { %1535 = vsyncadd (%p2065_p13), %s429_s29, 4294967168  ;;  %p2066_p11 = scmp.eq.s32.totalorder %s1657_s21, 0 }
  0xbb   : > { %1537 = dma.done.wait (%p2066_p11), [#allocation6], 1024   ;;  %p2067_p7 = pmov %p2066_p11 }
  0xbd   : > { %1539 = vsyncadd (%p2067_p7), [#allocation6], 4294966272  ;;  %p2068_p12 = pmov %p2067_p7 }
  0xbe   : > { %p2069_p1 = pmov %p2067_p7 }
  0xbf   : > { %1541 = dma.done.wait (%p2068_p12), [#allocation9], 2048  }
  0xc0   : > { %1543 = vsyncadd (%p2069_p1), [#allocation9], 4294965248  ;;  %v1571_v0 = vmov 0.0   ;;  %vm1572_vm0 = vmmov 0   ;;  %v1307_v1 = vld [vmem:[#allocation7] sm:$0xff]   ;;  %v1308_v2 = vld [vmem:[#allocation7 + $0x8] sm:$0xff]  }
  0xc1   : > { %1159 = vmatprep.subr.bf16.mxu0 %v1571_v0  ;;  %1175 = vmatprep.mubr.msk.bf16.mxu0 %vm1572_vm0, %v1571_v0  ;;  %v1309_v3 = vld [vmem:[#allocation7 + $0x10] sm:$0xff]   ;;  %v1316_v4 = vld [vmem:[#allocation8] sm:$0xff]   ;;  %v1310_v5 = vld [vmem:[#allocation7 + $0x18] sm:$0xff]   ;;  %s2070_s14 = sld [smem:[#allocation24_spill]]  ;;  %s2071_s8 = sld [smem:[#allocation25_spill]] }
  0xc2   : > { %1179 = vmatprep.subr.bf16.mxu1 %v1571_v0  ;;  %1195 = vmatprep.mubr.msk.bf16.mxu1 %vm1572_vm0, %v1571_v0  ;;  %v1317_v6 = vld [vmem:[#allocation8 + $0x8] sm:$0xff]   ;;  %v1311_v7 = vld [vmem:[#allocation7 + $0x20] sm:$0xff]   ;;  %v1318_v8 = vld [vmem:[#allocation8 + $0x10] sm:$0xff]   ;;  %s487_s25 = scalar_lea.vmem [#allocation11], %s1885_s12  ;;  %s2072_s6 = sld [smem:[#allocation26_spill]] }
  0xc3   : > { %1160 = vmatpush3.bf16.msra.mxu0 %v1307_v1  ;;  %1180 = vmatpush3.bf16.msra.mxu1 %v1316_v4  ;;  %v1312_v9 = vld [vmem:[#allocation7 + $0x28] sm:$0xff]   ;;  %v1319_v10 = vld [vmem:[#allocation8 + $0x18] sm:$0xff]   ;;  %v1313_v11 = vld [vmem:[#allocation7 + $0x30] sm:$0xff]   ;;  %s937_s29 = sshll.u32 %s487_s25, 4  ;;  %s924_s9 = scalar_lea.sflag [#allocation4], %s1882_s11  ;;  %s1974_s29 = int_to_ptr.vmem [resolvable:$true] %s937_s29 }
  0xc4   : > { %1161 = vmatprep.subr.bf16.mxu0 %v1571_v0  ;;  %1181 = vmatprep.subr.bf16.mxu1 %v1571_v0  ;;  %v1320_v12 = vld [vmem:[#allocation8 + $0x20] sm:$0xff]   ;;  %v1314_v13 = vld [vmem:[#allocation7 + $0x38] sm:$0xff]   ;;  %v1321_v14 = vld [vmem:[#allocation8 + $0x28] sm:$0xff]   ;;  %s1484_s27 = scalar_lea.vmem %s1974_s29, 128 }
  0xc5   : > { %v1315_v15 = vld [vmem:[%s423_s15] sm:$0xff]   ;;  %v1322_v16 = vld [vmem:[#allocation8 + $0x30] sm:$0xff]   ;;  %v1323_v17 = vld [vmem:[#allocation8 + $0x38] sm:$0xff]   ;;  %s1122_s15 = sshll.u32 %s1657_s21, 7  ;;  %p1485_p2 = scmp.ne.s32.totalorder %s1974_s29, %s1484_s27 }
  0xc6   : > { %v1080_v18 = vld [vmem:[%s2021_s3] ss:$0 sm:$0xff]  ;;  %v1325_v27 = vld [vmem:[#allocation10 + $0x8] sm:$0xff]   ;;  %v1326_v28 = vld [vmem:[#allocation10 + $0x10] sm:$0xff]   ;;  %s1573_s21 = smov [#allocation11]  }
  0xc7   : > { %1162 = vmatpush3.bf16.msra.mxu0 %v1308_v2  ;;  %1182 = vmatpush3.bf16.msra.mxu1 %v1317_v6  ;;  %v1324_v26 = vld [vmem:[#allocation10] sm:$0xff]   ;;  %v1327_v29 = vld [vmem:[#allocation10 + $0x18] sm:$0xff]   ;;  %v1329_v31 = vld [vmem:[#allocation10 + $0x28] sm:$0xff]   ;;  %p1486_p4 = pnand %p1485_p2, %p1790_p5  ;;  %s1488_s12 = sshll.u32 %s1573_s21, 4  ;;  %s1489_s12 = int_to_ptr.vmem [resolvable:$false] %s1488_s12 }
  0xc8   : > { %1163 = vmatprep.subr.bf16.mxu0 %v1571_v0  ;;  %1183 = vmatprep.subr.bf16.mxu1 %v1571_v0  ;;  %v1328_v30 = vld [vmem:[#allocation10 + $0x20] sm:$0xff]   ;;  %v1330_v32 = vld [vmem:[#allocation10 + $0x30] sm:$0xff]   ;;  %v1331_v33 = vld [vmem:[#allocation10 + $0x38] sm:$0xff]   ;;  %s1972_s28 = scalar_lea.hbm %s2072_s6, %s1122_s15  ;;  %s1490_s22 = scalar_lea.vmem %s1489_s12, 256 }
  0xc9   : > { %v1090_v34 = vld [vmem:[%s2023_s5] ss:$0 sm:$0xff]  ;;  %v1124_v61 = vld [vmem:[%s432_s2] sm:$0xff]   ;;  %p1487_p0 = pneg %p1486_p4  ;;  %p1491_p8 = scmp.lt.s32.totalorder %s1974_s29, %s1489_s12 }
  0xca   : > { %v1099_v60 = vld [vmem:[%s2025_s7] ss:$0 sm:$0xff]  ;;  %v1125_v1 = vunpack.c.l.bf16 %v1124_v61  ;;  %p1492_p6 = scmp.lt.s32.totalorder %s1490_s22, %s1484_s27 }
  0xcb   : > { %1164 = vmatpush3.bf16.msra.mxu0 %v1309_v3  ;;  %1184 = vmatpush3.bf16.msra.mxu1 %v1318_v8  ;;  %v1126_v8 = vunpack.c.h.bf16 %v1124_v61 }
  0xcc   : > { %1165 = vmatprep.subr.bf16.mxu0 %v1571_v0  ;;  %1185 = vmatprep.subr.bf16.mxu1 %v1571_v0  ;;  %p1493_p10 = por %p1492_p6, %p1491_p8 }
  0xce   : > { %p1494_p3 = pnand %p1493_p10, %p1487_p0 }
  0xcf   : > { %1166 = vmatpush3.bf16.msra.mxu0 %v1310_v5  ;;  %1186 = vmatpush3.bf16.msra.mxu1 %v1319_v10 }
  0xd0   : > { %1167 = vmatprep.subr.bf16.mxu0 %v1571_v0  ;;  %1187 = vmatprep.subr.bf16.mxu1 %v1571_v0 }
  0xd3   : > { %1168 = vmatpush3.bf16.msra.mxu0 %v1311_v7  ;;  %1188 = vmatpush3.bf16.msra.mxu1 %v1320_v12  ;;  %v1108_v12 = vld [vmem:[%s2028_s10] ss:$0 sm:$0xff] }
  0xd4   : > { %1169 = vmatprep.subr.bf16.mxu0 %v1571_v0  ;;  %1189 = vmatprep.subr.bf16.mxu1 %v1571_v0 }
  0xd7   : > { %1170 = vmatpush3.bf16.msra.mxu0 %v1312_v9  ;;  %1190 = vmatpush3.bf16.msra.mxu1 %v1321_v14 }
  0xd8   : > { %1171 = vmatprep.subr.bf16.mxu0 %v1571_v0  ;;  %1191 = vmatprep.subr.bf16.mxu1 %v1571_v0 }
  0xdb   : > { %1172 = vmatpush3.bf16.msra.mxu0 %v1313_v11  ;;  %1192 = vmatpush3.bf16.msra.mxu1 %v1322_v16 }
  0xdc   : > { %1173 = vmatprep.subr.bf16.mxu0 %v1571_v0  ;;  %1193 = vmatprep.subr.bf16.mxu1 %v1571_v0 }
  0xdf   : > { %1174 = vmatpush3.bf16.msra.mxu0 %v1314_v13  ;;  %1194 = vmatpush3.bf16.msra.mxu1 %v1323_v17 }
  0xe0   : > { %1199 = vmatprep.subr.bf16.mxu0 %v1571_v0 }
  0xe2   : > { %1176 = vmatmul.mubr.bf16.vlgmr.msra.gmra.mrb[0].mxu0 %v1315_v15 }
  0xe3   : > { %1215 = vmatprep.mubr.msk.bf16.mxu0 %vm1572_vm0, %v1571_v0  ;;  %1200 = vmatpush3.bf16.msra.mxu0 %v1324_v26 }
  0xe4   : > { %1201 = vmatprep.subr.bf16.mxu0 %v1571_v0 }
  0xe7   : > { %1202 = vmatpush3.bf16.msra.mxu0 %v1325_v27  ;;  %v1109_v27 = vld [vmem:[%s2070_s14] ss:$0 sm:$0xff] }
  0xe8   : > { %1203 = vmatprep.subr.bf16.mxu0 %v1571_v0 }
  0xeb   : > { %1204 = vmatpush3.bf16.msra.mxu0 %v1326_v28 }
  0xec   : > { %1205 = vmatprep.subr.bf16.mxu0 %v1571_v0 }
  0xef   : > { %1206 = vmatpush3.bf16.msra.mxu0 %v1327_v29 }
  0xf0   : > { %1207 = vmatprep.subr.bf16.mxu0 %v1571_v0 }
  0xf3   : > { %1208 = vmatpush3.bf16.msra.mxu0 %v1328_v30 }
  0xf4   : > { %1209 = vmatprep.subr.bf16.mxu0 %v1571_v0 }
  0xf7   : > { %1210 = vmatpush3.bf16.msra.mxu0 %v1329_v31 }
  0xf8   : > { %1211 = vmatprep.subr.bf16.mxu0 %v1571_v0 }
  0xfb   : > { %1212 = vmatpush3.bf16.msra.mxu0 %v1330_v32 }
  0xfc   : > { %1213 = vmatprep.subr.bf16.mxu0 %v1571_v0 }
  0xff   : > { %1214 = vmatpush3.bf16.msra.mxu0 %v1331_v33  ;;  %v1110_v33 = vld [vmem:[%s2071_s8] ss:$0 sm:$0xff] }
 0x1b5   : > { %v605_v19 = vpop.f32.mrb[0].mxu0 }
 0x1b6   : > { %v1177_v20 = vpop.f32.mrb[1].mxu0  ;;  %v1935_v22 = vadd.f32 %v1080_v18, %v605_v19 }
 0x1b7   : > { %v608_v21 = vpop.f32.mrb[2].mxu0 }
 0x1b8   : > { %v1937_v23 = vadd.f32 %v1080_v18, %v608_v21  ;;  %v1178_v24 = vpop.f32.mrb[3].mxu0 }
 0x1ba   : > { %v612_v25 = vpack.c.bf16 %v1937_v23, %v1935_v22 }
 0x1bc   : > { %1196 = vmatmul.mubr.bf16.vlgmr.msra.gmra.mrb[0].mxu1 %v612_v25 }
 0x28f   : > { %v718_v35 = vpop.f32.mrb[0].mxu1 }
 0x290   : > { %v719_v36 = vadd.f32 %v1090_v34, %v718_v35  ;;  %v1197_v37 = vpop.f32.mrb[1].mxu1 }
 0x291   : > { %v721_v38 = vpop.f32.mrb[2].mxu1 }
 0x292   : > { %v727_v39 = vmul.f32 0.044715, %v719_v36  ;;  %v722_v40 = vadd.f32 %v1090_v34, %v721_v38  ;;  %v1198_v41 = vpop.f32.mrb[3].mxu1  ;;  %v725_v54 = vmul.f32 0.5, %v719_v36 }
 0x294   : > { %v729_v42 = vmul.f32 %v727_v39, %v719_v36  ;;  %v728_v43 = vmul.f32 0.044715, %v722_v40  ;;  %v726_v55 = vmul.f32 0.5, %v722_v40 }
 0x296   : > { %v731_v44 = vmul.f32 %v729_v42, %v719_v36  ;;  %v730_v45 = vmul.f32 %v728_v43, %v722_v40 }
 0x298   : > { %v733_v46 = vadd.f32 %v731_v44, %v719_v36  ;;  %v732_v47 = vmul.f32 %v730_v45, %v722_v40 }
 0x29a   : > { %v735_v48 = vmul.f32 0.7978846, %v733_v46  ;;  %v734_v49 = vadd.f32 %v732_v47, %v722_v40 }
 0x29c   : > { %1332 = vtanh.f32 %v735_v48  ;;  %v736_v50 = vmul.f32 0.7978846, %v734_v49 }
 0x29e   : > { %1334 = vtanh.f32 %v736_v50 }
 0x2a6   : > { %v1333_v51 = vpop.eup %1332 }
 0x2a7   : > { %v739_v52 = vadd.f32 1.0, %v1333_v51 }
 0x2a8   : > { %v1335_v53 = vpop.eup %1334 }
 0x2a9   : > { %v740_v56 = vadd.f32 1.0, %v1335_v53  ;;  %v741_v57 = vmul.f32 %v739_v52, %v725_v54 }
 0x2ab   : > { %v742_v58 = vmul.f32 %v740_v56, %v726_v55 }
 0x2ad   : > { %v743_v59 = vpack.c.bf16 %v742_v58, %v741_v57 }
 0x2af   : > { %1216 = vmatmul.mubr.bf16.vlgmr.msra.gmra.mrb[4].mxu0 %v743_v59 }
 0x382   : > { %v849_v62 = vpop.f32.mrb[4].mxu0 }
 0x383   : > { %v850_v63 = vadd.f32 %v1099_v60, %v849_v62  ;;  %v1217_v0 = vpop.f32.mrb[5].mxu0 }
 0x384   : > { %v852_v2 = vpop.f32.mrb[6].mxu0 }
 0x385   : > { %v856_v3 = vadd.f32 %v850_v63, %v1935_v22  ;;  %v853_v4 = vadd.f32 %v1099_v60, %v852_v2  ;;  %v1218_v5 = vpop.f32.mrb[7].mxu0 }
 0x387   : > { %v857_v6 = vadd.f32 %v853_v4, %v1937_v23  ;;  %v862_v7 = vadd.f32 %v1125_v1, %v856_v3 }
 0x389   : > { %864 = vadd.xlane.f32.xlu0 %v862_v7  ;;  %v863_v9 = vadd.f32 %v1126_v8, %v857_v6 }
 0x38d   : > { %866 = vadd.xlane.f32.xlu0 %v863_v9 }
 0x416   : > { %v865_v10 = vpop.xlane.xlu0 %864 }
 0x417   : > { %v868_v11 = vmul.f32 0.03125, %v865_v10 }
 0x419   : > { %v870_v13 = vsub.f32 %v862_v7, %v868_v11 }
 0x41a   : > { %v867_v14 = vpop.xlane.xlu0 %866 }
 0x41b   : > { %v869_v15 = vmul.f32 0.03125, %v867_v14  ;;  %v879_v16 = vmul.f32 %v1108_v12, %v870_v13 }
 0x41d   : > { %v871_v17 = vsub.f32 %v863_v9, %v869_v15  ;;  %v881_v18 = vmul.f32 %v879_v16, %v879_v16  ;;  %v900_v29 = vmul.f32 %v1109_v27, %v879_v16 }
 0x41f   : > { %883 = vadd.xlane.f32.xlu1 %v881_v18  ;;  %v880_v19 = vmul.f32 %v1108_v12, %v871_v17 }
 0x421   : > { %v882_v20 = vmul.f32 %v880_v19, %v880_v19  ;;  %v901_v30 = vmul.f32 %v1109_v27, %v880_v19 }
 0x423   : > { %885 = vadd.xlane.f32.xlu1 %v882_v20 }
 0x4ac   : > { %v884_v21 = vpop.xlane.xlu1 %883 }
 0x4ad   : > { %v887_v22 = vmul.f32 0.03125, %v884_v21 }
 0x4af   : > { %v889_v23 = vadd.f32 1e-12, %v887_v22 }
 0x4b0   : > { %v886_v24 = vpop.xlane.xlu1 %885 }
 0x4b1   : > { %1336 = vrsqrt.f32 %v889_v23  ;;  %v888_v25 = vmul.f32 0.03125, %v886_v24 }
 0x4b3   : > { %v890_v26 = vadd.f32 1e-12, %v888_v25 }
 0x4b5   : > { %1338 = vrsqrt.f32 %v890_v26 }
 0x4bb   : > { %v1337_v28 = vpop.eup %1336 }
 0x4bc   : > { %v902_v31 = vmul.f32 %v1337_v28, %v900_v29 }
 0x4be   : > { %v911_v35 = vadd.f32 %v1110_v33, %v902_v31 }
 0x4bf   : > { %v1339_v32 = vpop.eup %1338 }
 0x4c0   : > { %v903_v34 = vmul.f32 %v1339_v32, %v901_v30 }
 0x4c2   : > { %v912_v36 = vadd.f32 %v1110_v33, %v903_v34 }
 0x4c4   : > { %v1130_v37 = vpack.c.bf16 %v912_v36, %v911_v35 }
 0x4c6   : > { %1131 = vst [vmem:[%s487_s25] sm:$0xff] %v1130_v37  }
 0x4c7   : > { %1497 = shalt.err (!%p1494_p3)
}
 0x4c8   : > { %s1498_s16 = scalar_lea.hbm %s1972_s28, 128  ;;  %s1502_s13 = scalar_lea.hbm %s2072_s6, 256 }
 0x4c9   : > { %p1499_p9 = scmp.ne.s32.totalorder %s1972_s28, %s1498_s16  ;;  %p1503_p7 = scmp.lt.u32.totalorder %s1972_s28, %s2072_s6 }
 0x4ca   : > { %p1504_p12 = scmp.lt.u32.totalorder %s1502_s13, %s1498_s16  ;;  %p1506_p2 = scmp.lt.u32.totalorder %s1498_s16, %s1972_s28 }
 0x4cb   : > { %p1500_p13 = pnand %p1499_p9, %p1790_p5 }
 0x4cc   : > { %p1505_p1 = por %p1504_p12, %p1503_p7 }
 0x4cd   : > { %p1501_p11 = pneg %p1500_p13 }
 0x4ce   : > { %p1507_p4 = por %p1506_p2, %p1505_p1 }
 0x4d0   : > { %p1508_p0 = pnand %p1507_p4, %p1501_p11 }
 0x4d2   : > { %1511 = shalt.err (!%p1508_p0)
}
 0x4d3   : > { %s1574_s0 = smov 64   ;;  %s1575_s8 = smov 4  }
 0x4d4   : > { %1235 = dma.vmem_to_hbm [thread:$0]  (%p1790_p5), %s1974_s29, 128, %s1972_s28, %s924_s9, %s1574_s0, %s1574_s0, %s1575_s8  }
 0x4d5 PF: > { %s2073_s15 = sld [smem:[#allocation17_spill]]  ;;  %s2074_s25 = sld [smem:[#allocation18_spill]] }
 0x4d6   : > { %p2076_p6 = scmp.ge.s32.totalorder %s1562_s20, 2 }
 0x4db   : > { %s952_s2 = sand.u32 1, %s2073_s15   ;;  %p2075_p8 = scmp.ne.s32.totalorder %s2074_s25, 0 }
 0x4dc   : > { %s953_s23 = scalar_lea.sflag [#allocation4], %s952_s2 }
 0x4dd   : > { %p1255_p10 = pnand %p2076_p6, %p2075_p8 }
 0x4df   : > { %1545 = dma.done.wait (!%p1255_p10), %s953_s23, 128  }
 0x4e0   : > { %1547 = vsyncadd (!%p1255_p10), %s953_s23, 4294967168  ;;  %s2077_s27 = sld [smem:[#allocation19_spill]]  ;;  %p28_p3 = scmp.ge.s32.totalorder %s1776_s24, 4  }
 0x4e1   : > { %s2078_s17 = smov %s1554_s18  ;;  %s2079_s18 = smov %s1558_s19 }
 0x4e2   : > { %s2081_s20 = smov %s1776_s24  ;;  %30 = sbr.rel (!%p28_p3) target bundleno = 16 (0x10), region = 134 }
 0x4e6   : > { %s2080_s19 = smov %s2077_s27 }
 0x4e9   :  { %958 = vsyncpa [#allocation3], 1 }
 0x4ea   :  { %960 = vsyncpa [#allocation3 + $0x1], 1 }
 0x4eb   :  { %961 = vsyncpa [#allocation6], 1 }
 0x4ec   :  { %963 = vsyncpa [#allocation6 + $0x1], 1 }
 0x4ed   :  { %964 = vsyncpa [#allocation9], 1 }
 0x4ee   :  { %965 = vsyncpa [#allocation4], 1 }
 0x4ef   :  { %967 = vsyncpa [#allocation4 + $0x1], 1 }

// kernel: tpu_custom_call.1
= control target key start
LH: loop header
LB: loop body
LE: loop exit
PB: predicated region body
PF: predicated region fallthrough
CT: control target
= control target key end

     0   :  { %s2018_s0 = inlined_call_operand.hbm [shape: bf16[32,128], index: 0, kind: input, shape index: {}]   ;;  %s2019_s1 = inlined_call_operand.hbm [shape: bf16[32,128], index: 1, kind: input, shape index: {}]   ;;  %s2020_s2 = inlined_call_operand.hbm [shape: bf16[128,128], index: 2, kind: input, shape index: {}]   ;;  %s2021_s3 = inlined_call_operand.vmem [shape: f32[1,128], index: 3, kind: input, shape index: {}]   ;;  %s2022_s4 = inlined_call_operand.hbm [shape: bf16[128,128], index: 4, kind: input, shape index: {}]   ;;  %s2023_s5 = inlined_call_operand.vmem [shape: f32[1,128], index: 5, kind: input, shape index: {}]   ;;  %s2024_s6 = inlined_call_operand.hbm [shape: bf16[128,128], index: 6, kind: input, shape index: {}]   ;;  %s2025_s7 = inlined_call_operand.vmem [shape: f32[1,128], index: 7, kind: input, shape index: {}]   ;;  %s2026_s8 = inlined_call_operand.vmem [shape: f32[1,128], index: 8, kind: input, shape index: {}]   ;;  %s2027_s9 = inlined_call_operand.vmem [shape: f32[1,128], index: 9, kind: input, shape index: {}]   ;;  %s2028_s10 = inlined_call_operand.vmem [shape: f32[1,128], index: 10, kind: input, shape index: {}]   ;;  %s2029_s11 = inlined_call_operand.hbm [shape: bf16[32,128], index: 11, kind: output, shape index: {}]  }
   0x1   :  { %2040 = sst [smem:[#allocation20_spill]] %s2018_s0 }
   0x2   :  { %2041 = sst [smem:[#allocation21_spill]] %s2020_s2 }
   0x3   :  { %2042 = sst [smem:[#allocation22_spill]] %s2022_s4 }
   0x4   :  { %2043 = sst [smem:[#allocation23_spill]] %s2024_s6 }
   0x5   :  { %2044 = sst [smem:[#allocation24_spill]] %s2026_s8 }
   0x6   :  { %2045 = sst [smem:[#allocation25_spill]] %s2027_s9 }
   0x7   :  { %2046 = sst [smem:[#allocation26_spill]] %s2029_s11 }
   0x8   :  { %16 = vsyncpa [#allocation3], 0 }
   0x9   :  { %18 = vsyncpa [#allocation3 + $0x1], 0 }
   0xa   :  { %19 = vsyncpa [#allocation6], 0 }
   0xb   :  { %21 = vsyncpa [#allocation6 + $0x1], 0 }
   0xc   :  { %22 = vsyncpa [#allocation9], 0 }
   0xd   :  { %23 = vsyncpa [#allocation4], 0 }
   0xe   :  { %25 = vsyncpa [#allocation4 + $0x1], 0  ;;  %s1636_s17 = smov 0   ;;  %s1638_s18 = smov 0  }
   0xf   :  { %s1640_s19 = smov 0   ;;  %s1642_s20 = smov 0  }
  0x10 LB: > { %2047 = sst [smem:[#allocation17_spill]] %s1550_s17  ;;  %s1657_s21 = sadd.s32 4294967295, %s1562_s20   ;;  %s1562_s20 = sphi %s1642_s20, %s2081_s20   ;;  %s1558_s19 = sphi %s1640_s19, %s2080_s19   ;;  %s1554_s18 = sphi %s1638_s18, %s2079_s18   ;;  %s1550_s17 = sphi %s1636_s17, %s2078_s17  }
  0x11   : > { %s1061_s22 = sadd.s32 4294967294, %s1562_s20   ;;  %p51_p0 = scmp.ne.s32.totalorder %s1554_s18, %s1550_s17 }
  0x12   : > { %p2031_p1 = scmp.eq.s32.totalorder %s1657_s21, 0  ;;  %p296_p3 = scmp.eq.s32.totalorder %s1061_s22, 1 }
  0x13   : > { %p1062_p5 = scmp.ge.s32.totalorder %s1562_s20, 1  ;;  %p303_p7 = scmp.lt.s32.totalorder %s1562_s20, 3 }
  0x14   : > { %p1666_p4 = por %p2031_p1, %p51_p0  ;;  %p1671_p6 = por %p296_p3, %p51_p0 }
  0x15   : > { %p1676_p8 = pnand %p1062_p5, %p303_p7  ;;  %s1564_s26 = smov [#allocation7]  }
  0x16   : > { %s2048_s23 = scalar_select %p1666_p4, 1, 0 }
  0x17   : > { %s2049_s24 = scalar_select %p1671_p6, 1, 0 }
  0x18   : > { %s2051_s25 = scalar_select %p1676_p8, 1, 0 }
  0x19   : > { %2050 = sst [smem:[#allocation18_spill]] %s2049_s24  ;;  %s315_s27 = sshll.u32 %s1564_s26, 4  ;;  %s1680_s27 = int_to_ptr.vmem [resolvable:$true] %s315_s27 }
  0x1a   : > { %p1237_p9 = pneg %p1676_p8  ;;  %s1565_s29 = smov [#allocation8]  }
  0x1b   : > { %s331_s30 = sshll.u32 %s1565_s29, 4  ;;  %s1566_s12 = smov [#allocation10]   ;;  %s1691_s30 = int_to_ptr.vmem [resolvable:$true] %s331_s30 }
  0x1c   : > { %p1687_p11 = pnand %p1237_p9, %p2031_p1  ;;  %s1693_s13 = sshll.u32 %s1566_s12, 4  ;;  %s348_s13 = int_to_ptr.vmem [resolvable:$true] %s1693_s13 }
  0x1d   : > { %s2053_s2 = sld [smem:[#allocation21_spill]] }
  0x1e   : > { %p1703_p13 = pneg %p1687_p11 }
  0x23   : > { %s1340_s16 = scalar_lea.hbm %s2053_s2, 1024 }
  0x24   : > { %p1341_p12 = scmp.ne.s32.totalorder %s2053_s2, %s1340_s16  ;;  %p1347_p5 = scmp.lt.u32.totalorder %s1340_s16, %s2053_s2 }
  0x26   : > { %p1343_p0 = pnand %p1703_p13, %p1341_p12 }
  0x28   : > { %p1344_p3 = pneg %p1343_p0 }
  0x2a   : > { %p1349_p7 = pnand %p1347_p5, %p1344_p3 }
  0x2c   : > { %1352 = shalt.err (!%p1349_p7)
}
  0x2d   : > { %s1353_s14 = scalar_lea.vmem %s1680_s27, 1024  ;;  %p1361_p2 = scmp.lt.s32.totalorder %s1680_s27, %s1680_s27 }
  0x2e   : > { %p1354_p9 = scmp.ne.s32.totalorder %s1680_s27, %s1353_s14  ;;  %p1362_p6 = scmp.lt.s32.totalorder %s1353_s14, %s1353_s14 }
  0x30   : > { %p1356_p10 = pnand %p1354_p9, %p1703_p13  ;;  %p1363_p12 = por %p1362_p6, %p1361_p2 }
  0x32   : > { %p1357_p1 = pneg %p1356_p10 }
  0x34   : > { %p1364_p0 = pnand %p1363_p12, %p1357_p1 }
  0x36   : > { %1367 = shalt.err (!%p1364_p0)
}
  0x37   : > { %s2036_s15 = smov 64   ;;  %s2038_s16 = smov 4  }
  0x38   : > { %1240 = dma.hbm_to_vmem [thread:$0]  (!%p1687_p11), %s2053_s2, 1024, %s1680_s27, [#allocation6], %s2036_s15, %s2036_s15, %s2038_s16  }
  0x39   : > { %s2055_s4 = sld [smem:[#allocation22_spill]] }
  0x3f   : > { %s1368_s14 = scalar_lea.hbm %s2055_s4, 1024 }
  0x40   : > { %p1369_p1 = scmp.ne.s32.totalorder %s2055_s4, %s1368_s14  ;;  %p1375_p10 = scmp.lt.u32.totalorder %s1368_s14, %s2055_s4 }
  0x42   : > { %p1371_p2 = pnand %p1369_p1, %p1703_p13 }
  0x44   : > { %p1372_p6 = pneg %p1371_p2 }
  0x46   : > { %p1377_p3 = pnand %p1375_p10, %p1372_p6 }
  0x48   : > { %1380 = shalt.err (!%p1377_p3)
}
  0x49   : > { %s1381_s27 = scalar_lea.vmem %s1691_s30, 1024  ;;  %p1389_p12 = scmp.lt.s32.totalorder %s1691_s30, %s1691_s30 }
  0x4a   : > { %p1382_p5 = scmp.ne.s32.totalorder %s1691_s30, %s1381_s27  ;;  %p1390_p0 = scmp.lt.s32.totalorder %s1381_s27, %s1381_s27 }
  0x4c   : > { %p1384_p7 = pnand %p1382_p5, %p1703_p13  ;;  %p1391_p1 = por %p1390_p0, %p1389_p12 }
  0x4e   : > { %p1385_p9 = pneg %p1384_p7 }
  0x50   : > { %p1392_p2 = pnand %p1391_p1, %p1385_p9 }
  0x52   : > { %1395 = shalt.err (!%p1392_p2)
}
  0x53   : > { %1243 = dma.hbm_to_vmem [thread:$0]  (!%p1687_p11), %s2055_s4, 1024, %s1691_s30, [#allocation9], %s2036_s15, %s2036_s15, %s2038_s16  }
  0x54   : > { %s2056_s6 = sld [smem:[#allocation23_spill]] }
  0x5a   : > { %s1396_s22 = scalar_lea.hbm %s2056_s6, 1024 }
  0x5b   : > { %p1397_p6 = scmp.ne.s32.totalorder %s2056_s6, %s1396_s22  ;;  %p1403_p5 = scmp.lt.u32.totalorder %s1396_s22, %s2056_s6 }
  0x5d   : > { %p1399_p10 = pnand %p1397_p6, %p1703_p13 }
  0x5f   : > { %p1400_p3 = pneg %p1399_p10 }
  0x61   : > { %p1405_p7 = pnand %p1403_p5, %p1400_p3 }
  0x63   : > { %1408 = shalt.err (!%p1405_p7)
}
  0x64   : > { %s1409_s27 = scalar_lea.vmem %s348_s13, 1024  ;;  %p1417_p1 = scmp.lt.s32.totalorder %s348_s13, %s348_s13 }
  0x65   : > { %p1410_p9 = scmp.ne.s32.totalorder %s348_s13, %s1409_s27  ;;  %p1418_p2 = scmp.lt.s32.totalorder %s1409_s27, %s1409_s27 }
  0x67   : > { %p1412_p12 = pnand %p1410_p9, %p1703_p13  ;;  %p1419_p4 = por %p1418_p2, %p1417_p1 }
  0x69   : > { %p1413_p0 = pneg %p1412_p12 }
  0x6b   : > { %p1420_p8 = pnand %p1419_p4, %p1413_p0 }
  0x6d   : > { %1423 = shalt.err (!%p1420_p8)
}
  0x6e   : > { %1246 = dma.hbm_to_vmem [thread:$0]  (!%p1687_p11), %s2056_s6, 1024, %s348_s13, [#allocation9], %s2036_s15, %s2036_s15, %s2038_s16  }
  0x6f   : > { %s1776_s24 = sadd.s32 1, %s1562_s20   ;;  %s38_s9 = sadd.s32 1, %s1558_s19 }
  0x70   : > { %s35_s28 = ssub.s32 %s1562_s20, %s1776_s24  ;;  %p45_p8 = scmp.ne.s32.totalorder %s1558_s19, %s1554_s18 }
  0x71   : > { %p36_p4 = scmp.eq.s32.totalorder %s35_s28, 0  ;;  %p46_p13 = scmp.eq.s32.totalorder %s1562_s20, 0 }
  0x72   : > { %p1261_p6 = scmp.lt.s32.totalorder %s1562_s20, 2  ;;  %p2058_p3 = scmp.eq.s32.totalorder %s1657_s21, 1 }
  0x73   : > { %s1786_s11 = scalar_select %p36_p4, %s1558_s19, %s38_s9  }
  0x74   : > { %p47_p10 = por %p46_p13, %p45_p8  ;;  %p1790_p5 = por %p2058_p3, %p45_p8 }
  0x75   : > { %2057 = sst [smem:[#allocation19_spill]] %s1786_s11  ;;  %s373_s22 = sand.u32 1, %s1558_s19  }
  0x76   : > { %s1118_s26 = sshll.u32 %s1562_s20, 7  ;;  %s1796_s13 = sshll.u32 %s373_s22, 3 }
  0x77   : > { %s2060_s0 = sld [smem:[#allocation20_spill]]  ;;  %s377_s27 = scalar_lea.vmem [#allocation2], %s1796_s13 }
  0x78   : > { %s384_s30 = sshll.u32 %s377_s27, 4  ;;  %p1804_p11 = pnand %p1261_p6, %p47_p10  ;;  %s1808_s30 = int_to_ptr.vmem [resolvable:$true] %s384_s30 }
  0x79   : > { %s1813_s29 = scalar_lea.hbm %s2019_s1, %s1118_s26  ;;  %s1815_s12 = scalar_lea.sflag [#allocation3], %s373_s22 }
  0x7a   : > { %p1426_p9 = pneg %p1804_p11 }
  0x7d   : > { %s1801_s14 = scalar_lea.hbm %s2060_s0, %s1118_s26  ;;  %s1429_s2 = scalar_lea.hbm %s2060_s0, 256 }
  0x7e   : > { %s1424_s15 = scalar_lea.hbm %s1801_s14, 128  ;;  %p1430_p1 = scmp.lt.u32.totalorder %s1801_s14, %s2060_s0 }
  0x7f   : > { %p1425_p7 = scmp.ne.s32.totalorder %s1801_s14, %s1424_s15  ;;  %p1431_p2 = scmp.lt.u32.totalorder %s1429_s2, %s1424_s15 }
  0x80   : > { %p1433_p8 = scmp.lt.u32.totalorder %s1424_s15, %s1801_s14 }
  0x81   : > { %p1427_p12 = pnand %p1426_p9, %p1425_p7  ;;  %p1432_p4 = por %p1431_p2, %p1430_p1 }
  0x83   : > { %p1428_p0 = pneg %p1427_p12  ;;  %p1434_p13 = por %p1433_p8, %p1432_p4 }
  0x85   : > { %p1435_p6 = pnand %p1434_p13, %p1428_p0 }
  0x87   : > { %1438 = shalt.err (!%p1435_p6)
}
  0x88   : > { %s1439_s22 = scalar_lea.vmem %s1808_s30, 128  ;;  %s1569_s16 = smov [#allocation2]  }
  0x89   : > { %p1440_p10 = scmp.ne.s32.totalorder %s1808_s30, %s1439_s22  ;;  %s1444_s26 = sshll.u32 %s1569_s16, 4  ;;  %s1445_s26 = int_to_ptr.vmem [resolvable:$false] %s1444_s26 }
  0x8a   : > { %s1446_s4 = scalar_lea.vmem %s1445_s26, 256  ;;  %p1447_p12 = scmp.lt.s32.totalorder %s1808_s30, %s1445_s26 }
  0x8b   : > { %p1442_p3 = pnand %p1440_p10, %p1426_p9  ;;  %p1448_p1 = scmp.lt.s32.totalorder %s1446_s4, %s1439_s22 }
  0x8d   : > { %p1443_p7 = pneg %p1442_p3  ;;  %p1449_p2 = por %p1448_p1, %p1447_p12 }
  0x8f   : > { %p1450_p4 = pnand %p1449_p2, %p1443_p7 }
  0x91   : > { %1453 = shalt.err (!%p1450_p4)
}
  0x92   : > { %s2062_s2 = smov 4   ;;  %s2063_s6 = smov 64  }
  0x93   : > { %1250 = dma.hbm_to_vmem [thread:$0]  (!%p1804_p11), %s1801_s14, 128, %s1808_s30, %s1815_s12, %s2063_s6, %s2063_s6, %s2062_s2  }
  0x94   : > { %s398_s15 = scalar_lea.vmem [#allocation5], %s1796_s13  ;;  %s394_s9 = sand.u32 1, %s1562_s20  }
  0x95   : > { %s405_s28 = sshll.u32 %s398_s15, 4  ;;  %s1850_s27 = scalar_lea.sflag [#allocation6], %s394_s9  ;;  %s1848_s28 = int_to_ptr.vmem [resolvable:$true] %s405_s28 }
  0x96   : > { %s1454_s22 = scalar_lea.hbm %s1813_s29, 128  ;;  %s1459_s4 = scalar_lea.hbm %s2019_s1, 256 }
  0x97   : > { %p1455_p0 = scmp.ne.s32.totalorder %s1813_s29, %s1454_s22  ;;  %p1460_p6 = scmp.lt.u32.totalorder %s1813_s29, %s2019_s1 }
  0x98   : > { %p1461_p10 = scmp.lt.u32.totalorder %s1459_s4, %s1454_s22  ;;  %p1463_p7 = scmp.lt.u32.totalorder %s1454_s22, %s1813_s29 }
  0x99   : > { %p1457_p8 = pnand %p1455_p0, %p1426_p9 }
  0x9a   : > { %p1462_p3 = por %p1461_p10, %p1460_p6 }
  0x9b   : > { %p1458_p13 = pneg %p1457_p8 }
  0x9c   : > { %p1464_p12 = por %p1463_p7, %p1462_p3 }
  0x9e   : > { %p1465_p1 = pnand %p1464_p12, %p1458_p13 }
  0xa0   : > { %1468 = shalt.err (!%p1465_p1)
}
  0xa1   : > { %s1469_s13 = scalar_lea.vmem %s1848_s28, 128  ;;  %s1570_s14 = smov [#allocation5]  }
  0xa2   : > { %p1470_p2 = scmp.ne.s32.totalorder %s1848_s28, %s1469_s13  ;;  %s1474_s30 = sshll.u32 %s1570_s14, 4  ;;  %s1475_s30 = int_to_ptr.vmem [resolvable:$false] %s1474_s30 }
  0xa3   : > { %s1476_s0 = scalar_lea.vmem %s1475_s30, 256  ;;  %p1477_p8 = scmp.lt.s32.totalorder %s1848_s28, %s1475_s30 }
  0xa4   : > { %p1472_p4 = pnand %p1470_p2, %p1426_p9  ;;  %p1478_p6 = scmp.lt.s32.totalorder %s1476_s0, %s1469_s13 }
  0xa6   : > { %p1473_p0 = pneg %p1472_p4  ;;  %p1479_p10 = por %p1478_p6, %p1477_p8 }
  0xa8   : > { %p1480_p3 = pnand %p1479_p10, %p1473_p0 }
  0xaa   : > { %1483 = shalt.err (!%p1480_p3)
}
  0xab   : > { %1253 = dma.hbm_to_vmem [thread:$0]  (!%p1804_p11), %s1813_s29, 128, %s1848_s28, %s1850_s27, %s2063_s6, %s2063_s6, %s2062_s2  }
  0xac   : > { %p2064_p9 = scmp.ne.s32.totalorder %s2051_s25, 0 }
  0xad   : > { %s1882_s11 = sand.u32 (!%p2064_p9), 1, %s1554_s18   ;;  %p2065_p13 = scmp.ne.s32.totalorder (!%p2064_p9), %s2048_s23, 0 }
  0xae   : > { %417 = sbr.rel (%p2064_p9) target bundleno = 1237 (0x4d5), region = 64  ;;  %s1885_s12 = sshll.u32 (!%p2064_p9), %s1882_s11, 3 }
  0xaf   : > { %s420_s8 = scalar_lea.sflag (!%p2064_p9), [#allocation3], %s1882_s11  ;;  %s423_s15 = scalar_lea.vmem (!%p2064_p9), [#allocation2], %s1885_s12 }
  0xb5   : > { %1529 = dma.done.wait (%p2065_p13), %s420_s8, 128  }
  0xb6   : > { %1531 = vsyncadd (%p2065_p13), %s420_s8, 4294967168  ;;  %s428_s25 = sand.u32 1, %s1657_s21   ;;  %s432_s2 = scalar_lea.vmem [#allocation5], %s1885_s12 }
  0xb7   : > { %s429_s29 = scalar_lea.sflag [#allocation6], %s428_s25 }
  0xb8   : > { %1533 = dma.done.wait (%p2065_p13), %s429_s29, 128  }
  0xb9   : > { %1535 = vsyncadd (%p2065_p13), %s429_s29, 4294967168  ;;  %p2066_p11 = scmp.eq.s32.totalorder %s1657_s21, 0 }
  0xbb   : > { %1537 = dma.done.wait (%p2066_p11), [#allocation6], 1024   ;;  %p2067_p7 = pmov %p2066_p11 }
  0xbd   : > { %1539 = vsyncadd (%p2067_p7), [#allocation6], 4294966272  ;;  %p2068_p12 = pmov %p2067_p7 }
  0xbe   : > { %p2069_p1 = pmov %p2067_p7 }
  0xbf   : > { %1541 = dma.done.wait (%p2068_p12), [#allocation9], 2048  }
  0xc0   : > { %1543 = vsyncadd (%p2069_p1), [#allocation9], 4294965248  ;;  %v1571_v0 = vmov 0.0   ;;  %vm1572_vm0 = vmmov 0   ;;  %v1307_v1 = vld [vmem:[#allocation7] sm:$0xff]   ;;  %v1308_v2 = vld [vmem:[#allocation7 + $0x8] sm:$0xff]  }
  0xc1   : > { %1159 = vmatprep.subr.bf16.mxu0 %v1571_v0  ;;  %1175 = vmatprep.mubr.msk.bf16.mxu0 %vm1572_vm0, %v1571_v0  ;;  %v1309_v3 = vld [vmem:[#allocation7 + $0x10] sm:$0xff]   ;;  %v1316_v4 = vld [vmem:[#allocation8] sm:$0xff]   ;;  %v1310_v5 = vld [vmem:[#allocation7 + $0x18] sm:$0xff]   ;;  %s2070_s14 = sld [smem:[#allocation24_spill]]  ;;  %s2071_s8 = sld [smem:[#allocation25_spill]] }
  0xc2   : > { %1179 = vmatprep.subr.bf16.mxu1 %v1571_v0  ;;  %1195 = vmatprep.mubr.msk.bf16.mxu1 %vm1572_vm0, %v1571_v0  ;;  %v1317_v6 = vld [vmem:[#allocation8 + $0x8] sm:$0xff]   ;;  %v1311_v7 = vld [vmem:[#allocation7 + $0x20] sm:$0xff]   ;;  %v1318_v8 = vld [vmem:[#allocation8 + $0x10] sm:$0xff]   ;;  %s487_s25 = scalar_lea.vmem [#allocation11], %s1885_s12  ;;  %s2072_s6 = sld [smem:[#allocation26_spill]] }
  0xc3   : > { %1160 = vmatpush3.bf16.msra.mxu0 %v1307_v1  ;;  %1180 = vmatpush3.bf16.msra.mxu1 %v1316_v4  ;;  %v1312_v9 = vld [vmem:[#allocation7 + $0x28] sm:$0xff]   ;;  %v1319_v10 = vld [vmem:[#allocation8 + $0x18] sm:$0xff]   ;;  %v1313_v11 = vld [vmem:[#allocation7 + $0x30] sm:$0xff]   ;;  %s937_s29 = sshll.u32 %s487_s25, 4  ;;  %s924_s9 = scalar_lea.sflag [#allocation4], %s1882_s11  ;;  %s1974_s29 = int_to_ptr.vmem [resolvable:$true] %s937_s29 }
  0xc4   : > { %1161 = vmatprep.subr.bf16.mxu0 %v1571_v0  ;;  %1181 = vmatprep.subr.bf16.mxu1 %v1571_v0  ;;  %v1320_v12 = vld [vmem:[#allocation8 + $0x20] sm:$0xff]   ;;  %v1314_v13 = vld [vmem:[#allocation7 + $0x38] sm:$0xff]   ;;  %v1321_v14 = vld [vmem:[#allocation8 + $0x28] sm:$0xff]   ;;  %s1484_s27 = scalar_lea.vmem %s1974_s29, 128 }
  0xc5   : > { %v1315_v15 = vld [vmem:[%s423_s15] sm:$0xff]   ;;  %v1322_v16 = vld [vmem:[#allocation8 + $0x30] sm:$0xff]   ;;  %v1323_v17 = vld [vmem:[#allocation8 + $0x38] sm:$0xff]   ;;  %s1122_s15 = sshll.u32 %s1657_s21, 7  ;;  %p1485_p2 = scmp.ne.s32.totalorder %s1974_s29, %s1484_s27 }
  0xc6   : > { %v1080_v18 = vld [vmem:[%s2021_s3] ss:$0 sm:$0xff]  ;;  %v1325_v27 = vld [vmem:[#allocation10 + $0x8] sm:$0xff]   ;;  %v1326_v28 = vld [vmem:[#allocation10 + $0x10] sm:$0xff]   ;;  %s1573_s21 = smov [#allocation11]  }
  0xc7   : > { %1162 = vmatpush3.bf16.msra.mxu0 %v1308_v2  ;;  %1182 = vmatpush3.bf16.msra.mxu1 %v1317_v6  ;;  %v1324_v26 = vld [vmem:[#allocation10] sm:$0xff]   ;;  %v1327_v29 = vld [vmem:[#allocation10 + $0x18] sm:$0xff]   ;;  %v1329_v31 = vld [vmem:[#allocation10 + $0x28] sm:$0xff]   ;;  %p1486_p4 = pnand %p1485_p2, %p1790_p5  ;;  %s1488_s12 = sshll.u32 %s1573_s21, 4  ;;  %s1489_s12 = int_to_ptr.vmem [resolvable:$false] %s1488_s12 }
  0xc8   : > { %1163 = vmatprep.subr.bf16.mxu0 %v1571_v0  ;;  %1183 = vmatprep.subr.bf16.mxu1 %v1571_v0  ;;  %v1328_v30 = vld [vmem:[#allocation10 + $0x20] sm:$0xff]   ;;  %v1330_v32 = vld [vmem:[#allocation10 + $0x30] sm:$0xff]   ;;  %v1331_v33 = vld [vmem:[#allocation10 + $0x38] sm:$0xff]   ;;  %s1972_s28 = scalar_lea.hbm %s2072_s6, %s1122_s15  ;;  %s1490_s22 = scalar_lea.vmem %s1489_s12, 256 }
  0xc9   : > { %v1090_v34 = vld [vmem:[%s2023_s5] ss:$0 sm:$0xff]  ;;  %v1124_v61 = vld [vmem:[%s432_s2] sm:$0xff]   ;;  %p1487_p0 = pneg %p1486_p4  ;;  %p1491_p8 = scmp.lt.s32.totalorder %s1974_s29, %s1489_s12 }
  0xca   : > { %v1099_v60 = vld [vmem:[%s2025_s7] ss:$0 sm:$0xff]  ;;  %v1125_v1 = vunpack.c.l.bf16 %v1124_v61  ;;  %p1492_p6 = scmp.lt.s32.totalorder %s1490_s22, %s1484_s27 }
  0xcb   : > { %1164 = vmatpush3.bf16.msra.mxu0 %v1309_v3  ;;  %1184 = vmatpush3.bf16.msra.mxu1 %v1318_v8  ;;  %v1126_v8 = vunpack.c.h.bf16 %v1124_v61 }
  0xcc   : > { %1165 = vmatprep.subr.bf16.mxu0 %v1571_v0  ;;  %1185 = vmatprep.subr.bf16.mxu1 %v1571_v0  ;;  %p1493_p10 = por %p1492_p6, %p1491_p8 }
  0xce   : > { %p1494_p3 = pnand %p1493_p10, %p1487_p0 }
  0xcf   : > { %1166 = vmatpush3.bf16.msra.mxu0 %v1310_v5  ;;  %1186 = vmatpush3.bf16.msra.mxu1 %v1319_v10 }
  0xd0   : > { %1167 = vmatprep.subr.bf16.mxu0 %v1571_v0  ;;  %1187 = vmatprep.subr.bf16.mxu1 %v1571_v0 }
  0xd3   : > { %1168 = vmatpush3.bf16.msra.mxu0 %v1311_v7  ;;  %1188 = vmatpush3.bf16.msra.mxu1 %v1320_v12  ;;  %v1108_v12 = vld [vmem:[%s2028_s10] ss:$0 sm:$0xff] }
  0xd4   : > { %1169 = vmatprep.subr.bf16.mxu0 %v1571_v0  ;;  %1189 = vmatprep.subr.bf16.mxu1 %v1571_v0 }
  0xd7   : > { %1170 = vmatpush3.bf16.msra.mxu0 %v1312_v9  ;;  %1190 = vmatpush3.bf16.msra.mxu1 %v1321_v14 }
  0xd8   : > { %1171 = vmatprep.subr.bf16.mxu0 %v1571_v0  ;;  %1191 = vmatprep.subr.bf16.mxu1 %v1571_v0 }
  0xdb   : > { %1172 = vmatpush3.bf16.msra.mxu0 %v1313_v11  ;;  %1192 = vmatpush3.bf16.msra.mxu1 %v1322_v16 }
  0xdc   : > { %1173 = vmatprep.subr.bf16.mxu0 %v1571_v0  ;;  %1193 = vmatprep.subr.bf16.mxu1 %v1571_v0 }
  0xdf   : > { %1174 = vmatpush3.bf16.msra.mxu0 %v1314_v13  ;;  %1194 = vmatpush3.bf16.msra.mxu1 %v1323_v17 }
  0xe0   : > { %1199 = vmatprep.subr.bf16.mxu0 %v1571_v0 }
  0xe2   : > { %1176 = vmatmul.mubr.bf16.vlgmr.msra.gmra.mrb[0].mxu0 %v1315_v15 }
  0xe3   : > { %1215 = vmatprep.mubr.msk.bf16.mxu0 %vm1572_vm0, %v1571_v0  ;;  %1200 = vmatpush3.bf16.msra.mxu0 %v1324_v26 }
  0xe4   : > { %1201 = vmatprep.subr.bf16.mxu0 %v1571_v0 }
  0xe7   : > { %1202 = vmatpush3.bf16.msra.mxu0 %v1325_v27  ;;  %v1109_v27 = vld [vmem:[%s2070_s14] ss:$0 sm:$0xff] }
  0xe8   : > { %1203 = vmatprep.subr.bf16.mxu0 %v1571_v0 }
  0xeb   : > { %1204 = vmatpush3.bf16.msra.mxu0 %v1326_v28 }
  0xec   : > { %1205 = vmatprep.subr.bf16.mxu0 %v1571_v0 }
  0xef   : > { %1206 = vmatpush3.bf16.msra.mxu0 %v1327_v29 }
  0xf0   : > { %1207 = vmatprep.subr.bf16.mxu0 %v1571_v0 }
  0xf3   : > { %1208 = vmatpush3.bf16.msra.mxu0 %v1328_v30 }
  0xf4   : > { %1209 = vmatprep.subr.bf16.mxu0 %v1571_v0 }
  0xf7   : > { %1210 = vmatpush3.bf16.msra.mxu0 %v1329_v31 }
  0xf8   : > { %1211 = vmatprep.subr.bf16.mxu0 %v1571_v0 }
  0xfb   : > { %1212 = vmatpush3.bf16.msra.mxu0 %v1330_v32 }
  0xfc   : > { %1213 = vmatprep.subr.bf16.mxu0 %v1571_v0 }
  0xff   : > { %1214 = vmatpush3.bf16.msra.mxu0 %v1331_v33  ;;  %v1110_v33 = vld [vmem:[%s2071_s8] ss:$0 sm:$0xff] }
 0x1b5   : > { %v605_v19 = vpop.f32.mrb[0].mxu0 }
 0x1b6   : > { %v1177_v20 = vpop.f32.mrb[1].mxu0  ;;  %v1935_v22 = vadd.f32 %v1080_v18, %v605_v19 }
 0x1b7   : > { %v608_v21 = vpop.f32.mrb[2].mxu0 }
 0x1b8   : > { %v1937_v23 = vadd.f32 %v1080_v18, %v608_v21  ;;  %v1178_v24 = vpop.f32.mrb[3].mxu0 }
 0x1ba   : > { %v612_v25 = vpack.c.bf16 %v1937_v23, %v1935_v22 }
 0x1bc   : > { %1196 = vmatmul.mubr.bf16.vlgmr.msra.gmra.mrb[0].mxu1 %v612_v25 }
 0x28f   : > { %v718_v35 = vpop.f32.mrb[0].mxu1 }
 0x290   : > { %v719_v36 = vadd.f32 %v1090_v34, %v718_v35  ;;  %v1197_v37 = vpop.f32.mrb[1].mxu1 }
 0x291   : > { %v721_v38 = vpop.f32.mrb[2].mxu1 }
 0x292   : > { %v727_v39 = vmul.f32 0.044715, %v719_v36  ;;  %v722_v40 = vadd.f32 %v1090_v34, %v721_v38  ;;  %v1198_v41 = vpop.f32.mrb[3].mxu1  ;;  %v725_v54 = vmul.f32 0.5, %v719_v36 }
 0x294   : > { %v729_v42 = vmul.f32 %v727_v39, %v719_v36  ;;  %v728_v43 = vmul.f32 0.044715, %v722_v40  ;;  %v726_v55 = vmul.f32 0.5, %v722_v40 }
 0x296   : > { %v731_v44 = vmul.f32 %v729_v42, %v719_v36  ;;  %v730_v45 = vmul.f32 %v728_v43, %v722_v40 }
 0x298   : > { %v733_v46 = vadd.f32 %v731_v44, %v719_v36  ;;  %v732_v47 = vmul.f32 %v730_v45, %v722_v40 }
 0x29a   : > { %v735_v48 = vmul.f32 0.7978846, %v733_v46  ;;  %v734_v49 = vadd.f32 %v732_v47, %v722_v40 }
 0x29c   : > { %1332 = vtanh.f32 %v735_v48  ;;  %v736_v50 = vmul.f32 0.7978846, %v734_v49 }
 0x29e   : > { %1334 = vtanh.f32 %v736_v50 }
 0x2a6   : > { %v1333_v51 = vpop.eup %1332 }
 0x2a7   : > { %v739_v52 = vadd.f32 1.0, %v1333_v51 }
 0x2a8   : > { %v1335_v53 = vpop.eup %1334 }
 0x2a9   : > { %v740_v56 = vadd.f32 1.0, %v1335_v53  ;;  %v741_v57 = vmul.f32 %v739_v52, %v725_v54 }
 0x2ab   : > { %v742_v58 = vmul.f32 %v740_v56, %v726_v55 }
 0x2ad   : > { %v743_v59 = vpack.c.bf16 %v742_v58, %v741_v57 }
 0x2af   : > { %1216 = vmatmul.mubr.bf16.vlgmr.msra.gmra.mrb[4].mxu0 %v743_v59 }
 0x382   : > { %v849_v62 = vpop.f32.mrb[4].mxu0 }
 0x383   : > { %v850_v63 = vadd.f32 %v1099_v60, %v849_v62  ;;  %v1217_v0 = vpop.f32.mrb[5].mxu0 }
 0x384   : > { %v852_v2 = vpop.f32.mrb[6].mxu0 }
 0x385   : > { %v856_v3 = vadd.f32 %v850_v63, %v1935_v22  ;;  %v853_v4 = vadd.f32 %v1099_v60, %v852_v2  ;;  %v1218_v5 = vpop.f32.mrb[7].mxu0 }
 0x387   : > { %v857_v6 = vadd.f32 %v853_v4, %v1937_v23  ;;  %v862_v7 = vadd.f32 %v1125_v1, %v856_v3 }
 0x389   : > { %864 = vadd.xlane.f32.xlu0 %v862_v7  ;;  %v863_v9 = vadd.f32 %v1126_v8, %v857_v6 }
 0x38d   : > { %866 = vadd.xlane.f32.xlu0 %v863_v9 }
 0x416   : > { %v865_v10 = vpop.xlane.xlu0 %864 }
 0x417   : > { %v868_v11 = vmul.f32 0.03125, %v865_v10 }
 0x419   : > { %v870_v13 = vsub.f32 %v862_v7, %v868_v11 }
 0x41a   : > { %v867_v14 = vpop.xlane.xlu0 %866 }
 0x41b   : > { %v869_v15 = vmul.f32 0.03125, %v867_v14  ;;  %v879_v16 = vmul.f32 %v1108_v12, %v870_v13 }
 0x41d   : > { %v871_v17 = vsub.f32 %v863_v9, %v869_v15  ;;  %v881_v18 = vmul.f32 %v879_v16, %v879_v16  ;;  %v900_v29 = vmul.f32 %v1109_v27, %v879_v16 }
 0x41f   : > { %883 = vadd.xlane.f32.xlu1 %v881_v18  ;;  %v880_v19 = vmul.f32 %v1108_v12, %v871_v17 }
 0x421   : > { %v882_v20 = vmul.f32 %v880_v19, %v880_v19  ;;  %v901_v30 = vmul.f32 %v1109_v27, %v880_v19 }
 0x423   : > { %885 = vadd.xlane.f32.xlu1 %v882_v20 }
 0x4ac   : > { %v884_v21 = vpop.xlane.xlu1 %883 }
 0x4ad   : > { %v887_v22 = vmul.f32 0.03125, %v884_v21 }
 0x4af   : > { %v889_v23 = vadd.f32 1e-12, %v887_v22 }
 0x4b0   : > { %v886_v24 = vpop.xlane.xlu1 %885 }
 0x4b1   : > { %1336 = vrsqrt.f32 %v889_v23  ;;  %v888_v25 = vmul.f32 0.03125, %v886_v24 }
 0x4b3   : > { %v890_v26 = vadd.f32 1e-12, %v888_v25 }
 0x4b5   : > { %1338 = vrsqrt.f32 %v890_v26 }
 0x4bb   : > { %v1337_v28 = vpop.eup %1336 }
 0x4bc   : > { %v902_v31 = vmul.f32 %v1337_v28, %v900_v29 }
 0x4be   : > { %v911_v35 = vadd.f32 %v1110_v33, %v902_v31 }
 0x4bf   : > { %v1339_v32 = vpop.eup %1338 }
 0x4c0   : > { %v903_v34 = vmul.f32 %v1339_v32, %v901_v30 }
 0x4c2   : > { %v912_v36 = vadd.f32 %v1110_v33, %v903_v34 }
 0x4c4   : > { %v1130_v37 = vpack.c.bf16 %v912_v36, %v911_v35 }
 0x4c6   : > { %1131 = vst [vmem:[%s487_s25] sm:$0xff] %v1130_v37  }
 0x4c7   : > { %1497 = shalt.err (!%p1494_p3)
}
 0x4c8   : > { %s1498_s16 = scalar_lea.hbm %s1972_s28, 128  ;;  %s1502_s13 = scalar_lea.hbm %s2072_s6, 256 }
 0x4c9   : > { %p1499_p9 = scmp.ne.s32.totalorder %s1972_s28, %s1498_s16  ;;  %p1503_p7 = scmp.lt.u32.totalorder %s1972_s28, %s2072_s6 }
 0x4ca   : > { %p1504_p12 = scmp.lt.u32.totalorder %s1502_s13, %s1498_s16  ;;  %p1506_p2 = scmp.lt.u32.totalorder %s1498_s16, %s1972_s28 }
 0x4cb   : > { %p1500_p13 = pnand %p1499_p9, %p1790_p5 }
 0x4cc   : > { %p1505_p1 = por %p1504_p12, %p1503_p7 }
 0x4cd   : > { %p1501_p11 = pneg %p1500_p13 }
 0x4ce   : > { %p1507_p4 = por %p1506_p2, %p1505_p1 }
 0x4d0   : > { %p1508_p0 = pnand %p1507_p4, %p1501_p11 }
 0x4d2   : > { %1511 = shalt.err (!%p1508_p0)
}
 0x4d3   : > { %s1574_s0 = smov 64   ;;  %s1575_s8 = smov 4  }
 0x4d4   : > { %1235 = dma.vmem_to_hbm [thread:$0]  (%p1790_p5), %s1974_s29, 128, %s1972_s28, %s924_s9, %s1574_s0, %s1574_s0, %s1575_s8  }
 0x4d5 PF: > { %s2073_s15 = sld [smem:[#allocation17_spill]]  ;;  %s2074_s25 = sld [smem:[#allocation18_spill]] }
 0x4d6   : > { %p2076_p6 = scmp.ge.s32.totalorder %s1562_s20, 2 }
 0x4db   : > { %s952_s2 = sand.u32 1, %s2073_s15   ;;  %p2075_p8 = scmp.ne.s32.totalorder %s2074_s25, 0 }
 0x4dc   : > { %s953_s23 = scalar_lea.sflag [#allocation4], %s952_s2 }
 0x4dd   : > { %p1255_p10 = pnand %p2076_p6, %p2075_p8 }
 0x4df   : > { %1545 = dma.done.wait (!%p1255_p10), %s953_s23, 128  }
 0x4e0   : > { %1547 = vsyncadd (!%p1255_p10), %s953_s23, 4294967168  ;;  %s2077_s27 = sld [smem:[#allocation19_spill]]  ;;  %p28_p3 = scmp.ge.s32.totalorder %s1776_s24, 4  }
 0x4e1   : > { %s2078_s17 = smov %s1554_s18  ;;  %s2079_s18 = smov %s1558_s19 }
 0x4e2   : > { %s2081_s20 = smov %s1776_s24  ;;  %30 = sbr.rel (!%p28_p3) target bundleno = 16 (0x10), region = 134 }
 0x4e6   : > { %s2080_s19 = smov %s2077_s27 }
 0x4e9   :  { %958 = vsyncpa [#allocation3], 1 }
 0x4ea   :  { %960 = vsyncpa [#allocation3 + $0x1], 1 }
 0x4eb   :  { %961 = vsyncpa [#allocation6], 1 }
 0x4ec   :  { %963 = vsyncpa [#allocation6 + $0x1], 1 }
 0x4ed   :  { %964 = vsyncpa [#allocation9], 1 }
 0x4ee   :  { %965 = vsyncpa [#allocation4], 1 }
 0x4ef   :  { %967 = vsyncpa [#allocation4 + $0x1], 1 }

</bundles_post_ra>
